<compile_context>
chip_gen: v7x
topology: tpu7x:2x2x1
jax: 0.10.0
libtpu: 0.0.40
codegen_flags: <defaults>
</compile_context>

<pallas_src>
import math
import functools

import jax
import jax.numpy as jnp
from jax import lax
from jax.experimental import pallas as pl
from jax.experimental.pallas import tpu as pltpu


def _round_up(x, m):
    return (x + m - 1) // m * m


def _lm_head_kernel(x_ref, w1_ref, fused_ref, wd_ref, o_ref, hn_ref, *, eps):
    """Grid = (row_tiles, vocab_tiles); vocab is the inner ('arbitrary') axis.

    x_ref:     [tm, H]   row tile of tokens
    w1_ref:    [H, H]    dense weight (grid-invariant)
    fused_ref: [3, H]    rows: b1, gamma, beta (grid-invariant)
    wd_ref:    [H, tn]   decoder weight tile (streamed over vocab)
    o_ref:     [tm, tn]  logits tile
    hn_ref:    [tm, H]   scratch holding post-LayerNorm activation in wd.dtype
    """
    # --- transform (dense + GELU + LayerNorm): only once per row tile ---
    @pl.when(pl.program_id(1) == 0)
    def _():
        x = x_ref[...]
        # MXU matmul in native operand dtype, f32 accumulation.
        h = jnp.dot(x, w1_ref[...], preferred_element_type=jnp.float32)

        fused = fused_ref[...].astype(jnp.float32)          # [3, H]
        b1 = fused[0:1, :]
        gamma = fused[1:2, :]
        beta = fused[2:3, :]

        h = h + b1

        # Exact (erf) GELU — matches torch.nn.functional.gelu default.
        h = 0.5 * h * (1.0 + lax.erf(h * (1.0 / math.sqrt(2.0))))

        # LayerNorm over the hidden dim (biased variance, eps inside rsqrt).
        mean = jnp.mean(h, axis=-1, keepdims=True)
        cent = h - mean
        var = jnp.mean(cent * cent, axis=-1, keepdims=True)
        hn = cent * lax.rsqrt(var + eps)
        hn = hn * gamma + beta

        # Single cast to the decoder/MXU dtype; reused by every vocab step.
        hn_ref[...] = hn.astype(hn_ref.dtype)

    # --- decoder: hn @ Wd_tile (no bias), every vocab step ---
    out = jnp.dot(hn_ref[...], wd_ref[...], preferred_element_type=jnp.float32)
    o_ref[...] = out.astype(o_ref.dtype)


def bert_lm_prediction_head(hidden_states, params, *, eps=1e-12,
                            tm=512, tn=1024, vocab_size=None, mxu_dtype=None,
                            min_row_tiles=1, vmem_limit_bytes=None,
                            single_buffer_invariants=True):
    """hidden_states: [B, S, H] -> logits [B, S, V].

    params["wd"] may be pre-padded along vocab (see init_params); the true
    vocab size is taken from `vocab_size` or params["vocab_size"].
    On v7x with decode-sized inputs pass min_row_tiles=2 so both TensorCores
    get a row tile.  Pass mxu_dtype=jnp.bfloat16 to feed the MXU bf16 operands.
    """
    B, S, H = hidden_states.shape
    M = B * S

    wd = params["wd"]
    Vd = wd.shape[1]                                   # decoder width (maybe pre-padded)
    V = vocab_size if vocab_size is not None else params.get("vocab_size", Vd)

    # --- row tile: >=16 (bf16 sublane pairs), prefer MXU-native multiples ---
    tm = max(16, min(tm, _round_up(M, 16)))
    if tm >= 256:
        tm = tm // 256 * 256
    elif tm >= 128:
        tm = tm // 128 * 128
    else:
        tm = tm // 16 * 16
    if min_row_tiles > 1:
        # Small-M (decode) megacore split: make sure the parallel row axis has
        # at least `min_row_tiles` tiles (duplicated transform cost is tiny).
        while _round_up(M, tm) // tm < min_row_tiles and tm > 16:
            tm = max(16, (tm // 2) // 16 * 16)
    Mp = _round_up(M, tm)

    # --- vocab tile: lane multiple of 128 ---
    tn = max(128, min(tn, _round_up(Vd, 128)))
    tn = tn // 128 * 128
    if Vd % tn != 0:
        # Fallback only: prefer padding Wd once at param-setup time so this
        # per-call HBM copy never happens (see init_params).
        Vd_pad = _round_up(Vd, tn)
        wd = jnp.pad(wd, ((0, 0), (0, Vd_pad - Vd)))
        Vd = Vd_pad

    x2d = hidden_states.reshape(M, H)
    w1 = params["w1"]
    if mxu_dtype is not None:
        x2d = x2d.astype(mxu_dtype)
        w1 = w1.astype(mxu_dtype)
        wd = wd.astype(mxu_dtype)
    if Mp != M:
        x2d = jnp.pad(x2d, ((0, Mp - M), (0, 0)))

    # Fuse the three [1, H] vectors into one [3, H] array (single DMA).
    fused = jnp.concatenate(
        [params["b1"], params["gamma"], params["beta"]], axis=0
    ).astype(params["b1"].dtype)

    kernel = functools.partial(_lm_head_kernel, eps=eps)

    x_item = jnp.dtype(x2d.dtype).itemsize
    w_item = jnp.dtype(w1.dtype).itemsize
    wd_item = jnp.dtype(wd.dtype).itemsize
    o_item = jnp.dtype(hidden_states.dtype).itemsize
    n_row_tiles = Mp // tm
    cost = pl.CostEstimate(
        flops=2 * Mp * H * H + 2 * Mp * H * Vd,
        transcendentals=Mp * H,                         # erf
        bytes_accessed=(Mp * H * x_item + H * H * w_item + 3 * H * w_item
                        + n_row_tiles * H * Vd * wd_item   # Wd re-read per row tile
                        + Mp * Vd * o_item),
    )

    def build_call(use_single_buffer):
        w1_spec = fused_spec = None
        if use_single_buffer and hasattr(pl, "Buffered"):
            try:
                pm = pl.Buffered(buffer_count=1)        # grid-invariant: 1 buffer
                w1_spec = pl.BlockSpec((H, H), lambda i, j: (0, 0), pipeline_mode=pm)
                fused_spec = pl.BlockSpec((3, H), lambda i, j: (0, 0), pipeline_mode=pm)
            except Exception:
                w1_spec = fused_spec = None
        if w1_spec is None:
            w1_spec = pl.BlockSpec((H, H), lambda i, j: (0, 0))
            fused_spec = pl.BlockSpec((3, H), lambda i, j: (0, 0))

        return pl.pallas_call(
            kernel,
            out_shape=jax.ShapeDtypeStruct((Mp, Vd), hidden_states.dtype),
            grid_spec=pltpu.PrefetchScalarGridSpec(
                num_scalar_prefetch=0,
                grid=(Mp // tm, Vd // tn),
                in_specs=[
                    pl.BlockSpec((tm, H), lambda i, j: (i, 0)),   # x row tile
                    w1_spec,                                      # W1 (invariant)
                    fused_spec,                                   # b1/gamma/beta
                    pl.BlockSpec((H, tn), lambda i, j: (0, j)),   # Wd over vocab
                ],
                out_specs=pl.BlockSpec((tm, tn), lambda i, j: (i, j)),
                # post-LN activation stored in the decoder/MXU dtype.
                scratch_shapes=[pltpu.VMEM((tm, H), wd.dtype)],
            ),
            compiler_params=pltpu.CompilerParams(
                dimension_semantics=("parallel", "arbitrary"),
                # Keep below ~48-56 MiB on v7x (64 MiB physical VMEM).
                vmem_limit_bytes=vmem_limit_bytes,
            ),
            cost_estimate=cost,
        )

    try:
        out2d = build_call(single_buffer_invariants)(x2d, w1, fused, wd)
    except Exception:
        if not single_buffer_invariants:
            raise
        # Single-buffered invariant specs not supported on this jax version:
        # retry with default double buffering.
        out2d = build_call(False)(x2d, w1, fused, wd)

    return out2d[:M, :V].reshape(B, S, V)


def init_params(key, hidden_size, vocab_size, dtype=jnp.float32,
                vocab_pad_multiple=1024):
    """Creates params; pads Wd ONCE along vocab so the forward never pads."""
    k1, k2, k3 = jax.random.split(key, 3)
    w1 = jax.random.normal(k1, (hidden_size, hidden_size), dtype) * 0.02
    b1 = jax.random.normal(k2, (1, hidden_size), dtype) * 0.02
    gamma = jnp.ones((1, hidden_size), dtype)
    beta = jnp.zeros((1, hidden_size), dtype)
    wd = jax.random.normal(k3, (hidden_size, vocab_size), dtype) * 0.02
    vp = _round_up(vocab_size, vocab_pad_multiple)
    if vp != vocab_size:
        wd = jnp.pad(wd, ((0, 0), (0, vp - vocab_size)))
    # NOTE: the module also defines `self.bias` ([vocab_size]) but its forward
    # never adds it, so it is intentionally unused here.
    return {"w1": w1, "b1": b1, "gamma": gamma, "beta": beta, "wd": wd,
            "vocab_size": vocab_size}


def _reference(hidden_states, params, eps):
    # Pure-JAX f32 reference of the same math, for a sanity check.
    V = params.get("vocab_size", params["wd"].shape[1])
    x = hidden_states.astype(jnp.float32)
    h = x @ params["w1"].astype(jnp.float32) + params["b1"].astype(jnp.float32)
    h = 0.5 * h * (1.0 + lax.erf(h / jnp.sqrt(2.0)))
    mean = jnp.mean(h, axis=-1, keepdims=True)
    var = jnp.mean((h - mean) ** 2, axis=-1, keepdims=True)
    hn = (h - mean) * lax.rsqrt(var + eps)
    hn = hn * params["gamma"].astype(jnp.float32) + params["beta"].astype(jnp.float32)
    out = hn @ params["wd"].astype(jnp.float32)
    return out[..., :V].astype(hidden_states.dtype)


if __name__ == "__main__":
    # Small but non-trivial shapes: multiple row tiles, multiple vocab tiles,
    # row padding (240 rows -> 256) and setup-time vocab padding (500 -> 1024).
    batch, seq, hidden, vocab = 2, 120, 128, 500
    eps = 1e-12

    key = jax.random.PRNGKey(0)
    k_x, k_p = jax.random.split(key)
    hidden_states = jax.random.normal(k_x, (batch, seq, hidden), jnp.float32)
    params = init_params(k_p, hidden, vocab)

    ref = _reference(hidden_states, params, eps)

    # f32-operand path: tight check against the pure-JAX reference.
    out = bert_lm_prediction_head(hidden_states, params, eps=eps, tm=128, tn=256)
    out = jax.block_until_ready(out)
    assert out.shape == (batch, seq, vocab)
    assert jnp.allclose(out, ref, atol=1e-3, rtol=1e-3), (
        float(jnp.max(jnp.abs(out - ref))))

    # bf16 MXU-operand path (the production configuration): looser tolerance.
    out_bf16 = bert_lm_prediction_head(hidden_states, params, eps=eps,
                                       tm=128, tn=256, mxu_dtype=jnp.bfloat16)
    out_bf16 = jax.block_until_ready(out_bf16)
    assert out_bf16.shape == (batch, seq, vocab)
    assert float(jnp.max(jnp.abs(out_bf16.astype(jnp.float32)
                                 - ref.astype(jnp.float32)))) < 0.1

    print("KERNEL_OK")
</pallas_src>

<mosaic_0001>
module attributes {stable_mosaic.version = 11 : i64} {
  func.func @_lm_head_kernel(%arg0: i32, %arg1: i32, %arg2: memref<128x128xf32, #tpu.memory_space<vmem>>, %arg3: memref<128x128xf32, #tpu.memory_space<vmem>>, %arg4: memref<3x128xf32, #tpu.memory_space<vmem>>, %arg5: memref<128x256xf32, #tpu.memory_space<vmem>>, %arg6: memref<128x256xf32, #tpu.memory_space<vmem>>, %arg7: memref<128x128xf32, #tpu.memory_space<vmem>>) attributes {dimension_semantics = [#tpu.dimension_semantics<parallel>, #tpu.dimension_semantics<arbitrary>], iteration_bounds = array<i64: 2, 4>, scalar_prefetch = 0 : i64, scratch_operands = 1 : i64, tpu.core_type = #tpu.core_type<tc>, window_params = [{transform_indices = @transform_0, window_bounds = array<i64: 128, 128>}, {pipeline_mode = #tpu.pipeline_mode<synchronous>, transform_indices = @transform_1, window_bounds = array<i64: 128, 128>}, {pipeline_mode = #tpu.pipeline_mode<synchronous>, transform_indices = @transform_2, window_bounds = array<i64: 3, 128>}, {transform_indices = @transform_3, window_bounds = array<i64: 128, 256>}, {transform_indices = @transform_4, window_bounds = array<i64: 128, 256>}]} {
    %c0_i32 = arith.constant 0 : i32
    %0 = arith.cmpi eq, %arg1, %c0_i32 : i32
    %1 = arith.extui %0 : i1 to i32
    %c0_i32_0 = arith.constant 0 : i32
    %2 = arith.cmpi ne, %1, %c0_i32_0 : i32
    scf.if %2 {
      %c0_6 = arith.constant 0 : index
      %c0_7 = arith.constant 0 : index
      %7 = vector.load %arg2[%c0_6, %c0_7] : memref<128x128xf32, #tpu.memory_space<vmem>>, vector<128x128xf32>
      %c0_8 = arith.constant 0 : index
      %c0_9 = arith.constant 0 : index
      %8 = vector.load %arg3[%c0_8, %c0_9] : memref<128x128xf32, #tpu.memory_space<vmem>>, vector<128x128xf32>
      %cst_10 = arith.constant dense<0.000000e+00> : vector<128x128xf32>
      %9 = tpu.matmul %7, %8, %cst_10 {dimension_numbers = #tpu.dot_dimension_numbers<[1], [0], [0], [1], [0, 0, 1, 1], [], []>} : vector<128x128xf32>, vector<128x128xf32>, vector<128x128xf32> -> vector<128x128xf32>
      %c0_11 = arith.constant 0 : index
      %c0_12 = arith.constant 0 : index
      %10 = vector.load %arg4[%c0_11, %c0_12] : memref<3x128xf32, #tpu.memory_space<vmem>>, vector<3x128xf32>
      %11 = vector.extract_strided_slice %10 {offsets = [0, 0], sizes = [1, 128], strides = [1, 1]} : vector<3x128xf32> to vector<1x128xf32>
      %12 = vector.extract_strided_slice %10 {offsets = [1, 0], sizes = [1, 128], strides = [1, 1]} : vector<3x128xf32> to vector<1x128xf32>
      %13 = vector.extract_strided_slice %10 {offsets = [2, 0], sizes = [1, 128], strides = [1, 1]} : vector<3x128xf32> to vector<1x128xf32>
      %14 = vector.broadcast %11 : vector<1x128xf32> to vector<128x128xf32>
      %15 = arith.addf %9, %14 : vector<128x128xf32>
      %cst_13 = arith.constant 5.000000e-01 : f32
      %16 = vector.broadcast %cst_13 : f32 to vector<128x128xf32>
      %17 = arith.mulf %16, %15 : vector<128x128xf32>
      %cst_14 = arith.constant 0.707106769 : f32
      %18 = vector.broadcast %cst_14 : f32 to vector<128x128xf32>
      %19 = arith.mulf %15, %18 : vector<128x128xf32>
      %20 = math.erf %19 : vector<128x128xf32>
      %cst_15 = arith.constant 1.000000e+00 : f32
      %21 = vector.broadcast %cst_15 : f32 to vector<128x128xf32>
      %22 = arith.addf %21, %20 : vector<128x128xf32>
      %23 = arith.mulf %17, %22 : vector<128x128xf32>
      %cst_16 = arith.constant dense<0.000000e+00> : vector<128xf32>
      %24 = vector.multi_reduction <add>, %23, %cst_16 [1] : vector<128x128xf32> to vector<128xf32>
      %25 = vector.shape_cast %24 : vector<128xf32> to vector<128x1xf32>
      %cst_17 = arith.constant 1.280000e+02 : f32
      %26 = vector.broadcast %cst_17 : f32 to vector<128x1xf32>
      %27 = arith.divf %25, %26 : vector<128x1xf32>
      %28 = vector.broadcast %27 : vector<128x1xf32> to vector<128x128xf32>
      %29 = arith.subf %23, %28 : vector<128x128xf32>
      %30 = arith.mulf %29, %29 : vector<128x128xf32>
      %cst_18 = arith.constant dense<0.000000e+00> : vector<128xf32>
      %31 = vector.multi_reduction <add>, %30, %cst_18 [1] : vector<128x128xf32> to vector<128xf32>
      %32 = vector.shape_cast %31 : vector<128xf32> to vector<128x1xf32>
      %cst_19 = arith.constant 1.280000e+02 : f32
      %33 = vector.broadcast %cst_19 : f32 to vector<128x1xf32>
      %34 = arith.divf %32, %33 : vector<128x1xf32>
      %cst_20 = arith.constant 9.99999996E-13 : f32
      %35 = vector.broadcast %cst_20 : f32 to vector<128x1xf32>
      %36 = arith.addf %34, %35 : vector<128x1xf32>
      %37 = math.rsqrt %36 : vector<128x1xf32>
      %38 = vector.broadcast %37 : vector<128x1xf32> to vector<128x128xf32>
      %39 = arith.mulf %29, %38 : vector<128x128xf32>
      %40 = vector.broadcast %12 : vector<1x128xf32> to vector<128x128xf32>
      %41 = arith.mulf %39, %40 : vector<128x128xf32>
      %42 = vector.broadcast %13 : vector<1x128xf32> to vector<128x128xf32>
      %43 = arith.addf %41, %42 : vector<128x128xf32>
      %c0_21 = arith.constant 0 : index
      %c0_22 = arith.constant 0 : index
      %44 = vector.load %arg7[%c0_21, %c0_22] : memref<128x128xf32, #tpu.memory_space<vmem>>, vector<128x128xf32>
      tpu.vector_store %arg7[%c0_21, %c0_22], %43 {strides = array<i32>} : memref<128x128xf32, #tpu.memory_space<vmem>>, vector<128x128xf32>,
    } else {
    }
    %c0 = arith.constant 0 : index
    %c0_1 = arith.constant 0 : index
    %3 = vector.load %arg7[%c0, %c0_1] : memref<128x128xf32, #tpu.memory_space<vmem>>, vector<128x128xf32>
    %c0_2 = arith.constant 0 : index
    %c0_3 = arith.constant 0 : index
    %4 = vector.load %arg5[%c0_2, %c0_3] : memref<128x256xf32, #tpu.memory_space<vmem>>, vector<128x256xf32>
    %cst = arith.constant dense<0.000000e+00> : vector<128x256xf32>
    %5 = tpu.matmul %3, %4, %cst {dimension_numbers = #tpu.dot_dimension_numbers<[1], [0], [0], [1], [0, 0, 1, 1], [], []>} : vector<128x128xf32>, vector<128x256xf32>, vector<128x256xf32> -> vector<128x256xf32>
    %c0_4 = arith.constant 0 : index
    %c0_5 = arith.constant 0 : index
    %6 = vector.load %arg6[%c0_4, %c0_5] : memref<128x256xf32, #tpu.memory_space<vmem>>, vector<128x256xf32>
    tpu.vector_store %arg6[%c0_4, %c0_5], %5 {strides = array<i32>} : memref<128x256xf32, #tpu.memory_space<vmem>>, vector<128x256xf32>,
    return
  }
  func.func @transform_0(%arg0: i32, %arg1: i32) -> (i32, i32) {
    %c0_i32 = arith.constant 0 : i32
    %c0_i32_0 = arith.constant 0 : i32
    return %arg0, %c0_i32 : i32, i32
  }
  func.func @transform_1(%arg0: i32, %arg1: i32) -> (i32, i32) {
    %c0_i32 = arith.constant 0 : i32
    %c0_i32_0 = arith.constant 0 : i32
    %c0_i32_1 = arith.constant 0 : i32
    return %c0_i32, %c0_i32_0 : i32, i32
  }
  func.func @transform_2(%arg0: i32, %arg1: i32) -> (i32, i32) {
    %c0_i32 = arith.constant 0 : i32
    %c0_i32_0 = arith.constant 0 : i32
    %c0_i32_1 = arith.constant 0 : i32
    return %c0_i32, %c0_i32_0 : i32, i32
  }
  func.func @transform_3(%arg0: i32, %arg1: i32) -> (i32, i32) {
    %c0_i32 = arith.constant 0 : i32
    %c0_i32_0 = arith.constant 0 : i32
    return %c0_i32, %arg1 : i32, i32
  }
  func.func @transform_4(%arg0: i32, %arg1: i32) -> (i32, i32) {
    %c0_i32 = arith.constant 0 : i32
    return %arg0, %arg1 : i32, i32
  }
}

module attributes {stable_mosaic.version = 11 : i64} {
  func.func @_lm_head_kernel(%arg0: i32, %arg1: i32, %arg2: memref<128x128xf32, #tpu.memory_space<vmem>>, %arg3: memref<128x128xf32, #tpu.memory_space<vmem>>, %arg4: memref<3x128xf32, #tpu.memory_space<vmem>>, %arg5: memref<128x256xf32, #tpu.memory_space<vmem>>, %arg6: memref<128x256xf32, #tpu.memory_space<vmem>>, %arg7: memref<128x128xf32, #tpu.memory_space<vmem>>) attributes {dimension_semantics = [#tpu.dimension_semantics<parallel>, #tpu.dimension_semantics<arbitrary>], iteration_bounds = array<i64: 2, 4>, scalar_prefetch = 0 : i64, scratch_operands = 1 : i64, tpu.core_type = #tpu.core_type<tc>, window_params = [{transform_indices = @transform_0, window_bounds = array<i64: 128, 128>}, {pipeline_mode = #tpu.pipeline_mode<synchronous>, transform_indices = @transform_1, window_bounds = array<i64: 128, 128>}, {pipeline_mode = #tpu.pipeline_mode<synchronous>, transform_indices = @transform_2, window_bounds = array<i64: 3, 128>}, {transform_indices = @transform_3, window_bounds = array<i64: 128, 256>}, {transform_indices = @transform_4, window_bounds = array<i64: 128, 256>}]} {
    %c0_i32 = arith.constant 0 : i32
    %0 = arith.cmpi eq, %arg1, %c0_i32 : i32
    %1 = arith.extui %0 : i1 to i32
    %c0_i32_0 = arith.constant 0 : i32
    %2 = arith.cmpi ne, %1, %c0_i32_0 : i32
    scf.if %2 {
      %c0_6 = arith.constant 0 : index
      %c0_7 = arith.constant 0 : index
      %7 = vector.load %arg2[%c0_6, %c0_7] : memref<128x128xf32, #tpu.memory_space<vmem>>, vector<128x128xf32>
      %c0_8 = arith.constant 0 : index
      %c0_9 = arith.constant 0 : index
      %8 = vector.load %arg3[%c0_8, %c0_9] : memref<128x128xf32, #tpu.memory_space<vmem>>, vector<128x128xf32>
      %cst_10 = arith.constant dense<0.000000e+00> : vector<128x128xf32>
      %9 = tpu.matmul %7, %8, %cst_10 {dimension_numbers = #tpu.dot_dimension_numbers<[1], [0], [0], [1], [0, 0, 1, 1], [], []>} : vector<128x128xf32>, vector<128x128xf32>, vector<128x128xf32> -> vector<128x128xf32>
      %c0_11 = arith.constant 0 : index
      %c0_12 = arith.constant 0 : index
      %10 = vector.load %arg4[%c0_11, %c0_12] : memref<3x128xf32, #tpu.memory_space<vmem>>, vector<3x128xf32>
      %11 = vector.extract_strided_slice %10 {offsets = [0, 0], sizes = [1, 128], strides = [1, 1]} : vector<3x128xf32> to vector<1x128xf32>
      %12 = vector.extract_strided_slice %10 {offsets = [1, 0], sizes = [1, 128], strides = [1, 1]} : vector<3x128xf32> to vector<1x128xf32>
      %13 = vector.extract_strided_slice %10 {offsets = [2, 0], sizes = [1, 128], strides = [1, 1]} : vector<3x128xf32> to vector<1x128xf32>
      %14 = vector.broadcast %11 : vector<1x128xf32> to vector<128x128xf32>
      %15 = arith.addf %9, %14 : vector<128x128xf32>
      %cst_13 = arith.constant 5.000000e-01 : f32
      %16 = vector.broadcast %cst_13 : f32 to vector<128x128xf32>
      %17 = arith.mulf %16, %15 : vector<128x128xf32>
      %cst_14 = arith.constant 0.707106769 : f32
      %18 = vector.broadcast %cst_14 : f32 to vector<128x128xf32>
      %19 = arith.mulf %15, %18 : vector<128x128xf32>
      %20 = math.erf %19 : vector<128x128xf32>
      %cst_15 = arith.constant 1.000000e+00 : f32
      %21 = vector.broadcast %cst_15 : f32 to vector<128x128xf32>
      %22 = arith.addf %21, %20 : vector<128x128xf32>
      %23 = arith.mulf %17, %22 : vector<128x128xf32>
      %cst_16 = arith.constant dense<0.000000e+00> : vector<128xf32>
      %24 = vector.multi_reduction <add>, %23, %cst_16 [1] : vector<128x128xf32> to vector<128xf32>
      %25 = vector.shape_cast %24 : vector<128xf32> to vector<128x1xf32>
      %cst_17 = arith.constant 1.280000e+02 : f32
      %26 = vector.broadcast %cst_17 : f32 to vector<128x1xf32>
      %27 = arith.divf %25, %26 : vector<128x1xf32>
      %28 = vector.broadcast %27 : vector<128x1xf32> to vector<128x128xf32>
      %29 = arith.subf %23, %28 : vector<128x128xf32>
      %30 = arith.mulf %29, %29 : vector<128x128xf32>
      %cst_18 = arith.constant dense<0.000000e+00> : vector<128xf32>
      %31 = vector.multi_reduction <add>, %30, %cst_18 [1] : vector<128x128xf32> to vector<128xf32>
      %32 = vector.shape_cast %31 : vector<128xf32> to vector<128x1xf32>
      %cst_19 = arith.constant 1.280000e+02 : f32
      %33 = vector.broadcast %cst_19 : f32 to vector<128x1xf32>
      %34 = arith.divf %32, %33 : vector<128x1xf32>
      %cst_20 = arith.constant 9.99999996E-13 : f32
      %35 = vector.broadcast %cst_20 : f32 to vector<128x1xf32>
      %36 = arith.addf %34, %35 : vector<128x1xf32>
      %37 = math.rsqrt %36 : vector<128x1xf32>
      %38 = vector.broadcast %37 : vector<128x1xf32> to vector<128x128xf32>
      %39 = arith.mulf %29, %38 : vector<128x128xf32>
      %40 = vector.broadcast %12 : vector<1x128xf32> to vector<128x128xf32>
      %41 = arith.mulf %39, %40 : vector<128x128xf32>
      %42 = vector.broadcast %13 : vector<1x128xf32> to vector<128x128xf32>
      %43 = arith.addf %41, %42 : vector<128x128xf32>
      %c0_21 = arith.constant 0 : index
      %c0_22 = arith.constant 0 : index
      %44 = vector.load %arg7[%c0_21, %c0_22] : memref<128x128xf32, #tpu.memory_space<vmem>>, vector<128x128xf32>
      tpu.vector_store %arg7[%c0_21, %c0_22], %43 {strides = array<i32>} : memref<128x128xf32, #tpu.memory_space<vmem>>, vector<128x128xf32>,
    } else {
    }
    %c0 = arith.constant 0 : index
    %c0_1 = arith.constant 0 : index
    %3 = vector.load %arg7[%c0, %c0_1] : memref<128x128xf32, #tpu.memory_space<vmem>>, vector<128x128xf32>
    %c0_2 = arith.constant 0 : index
    %c0_3 = arith.constant 0 : index
    %4 = vector.load %arg5[%c0_2, %c0_3] : memref<128x256xf32, #tpu.memory_space<vmem>>, vector<128x256xf32>
    %cst = arith.constant dense<0.000000e+00> : vector<128x256xf32>
    %5 = tpu.matmul %3, %4, %cst {dimension_numbers = #tpu.dot_dimension_numbers<[1], [0], [0], [1], [0, 0, 1, 1], [], []>} : vector<128x128xf32>, vector<128x256xf32>, vector<128x256xf32> -> vector<128x256xf32>
    %c0_4 = arith.constant 0 : index
    %c0_5 = arith.constant 0 : index
    %6 = vector.load %arg6[%c0_4, %c0_5] : memref<128x256xf32, #tpu.memory_space<vmem>>, vector<128x256xf32>
    tpu.vector_store %arg6[%c0_4, %c0_5], %5 {strides = array<i32>} : memref<128x256xf32, #tpu.memory_space<vmem>>, vector<128x256xf32>,
    return
  }
  func.func @transform_0(%arg0: i32, %arg1: i32) -> (i32, i32) {
    %c0_i32 = arith.constant 0 : i32
    %c0_i32_0 = arith.constant 0 : i32
    return %arg0, %c0_i32 : i32, i32
  }
  func.func @transform_1(%arg0: i32, %arg1: i32) -> (i32, i32) {
    %c0_i32 = arith.constant 0 : i32
    %c0_i32_0 = arith.constant 0 : i32
    %c0_i32_1 = arith.constant 0 : i32
    return %c0_i32, %c0_i32_0 : i32, i32
  }
  func.func @transform_2(%arg0: i32, %arg1: i32) -> (i32, i32) {
    %c0_i32 = arith.constant 0 : i32
    %c0_i32_0 = arith.constant 0 : i32
    %c0_i32_1 = arith.constant 0 : i32
    return %c0_i32, %c0_i32_0 : i32, i32
  }
  func.func @transform_3(%arg0: i32, %arg1: i32) -> (i32, i32) {
    %c0_i32 = arith.constant 0 : i32
    %c0_i32_0 = arith.constant 0 : i32
    return %c0_i32, %arg1 : i32, i32
  }
  func.func @transform_4(%arg0: i32, %arg1: i32) -> (i32, i32) {
    %c0_i32 = arith.constant 0 : i32
    return %arg0, %arg1 : i32, i32
  }
}

</mosaic_0001>

<bundles_post_ra>
// kernel: tpu_custom_call.1
= control target key start
LH: loop header
LB: loop body
LE: loop exit
PB: predicated region body
PF: predicated region fallthrough
CT: control target
= control target key end

     0   :  { %s2613_s0 = inlined_call_operand.hbm [shape: f32[256,128], index: 0, kind: input, shape index: {}]   ;;  %s2614_s1 = inlined_call_operand.hbm [shape: f32[128,128], index: 1, kind: input, shape index: {}]   ;;  %s2615_s2 = inlined_call_operand.vmem [shape: f32[3,128], index: 2, kind: input, shape index: {}]   ;;  %s2616_s3 = inlined_call_operand.hbm [shape: f32[128,1024], index: 3, kind: input, shape index: {}]   ;;  %s2617_s4 = inlined_call_operand.hbm [shape: f32[256,1024], index: 4, kind: output, shape index: {}]  }
   0x1   :  { %2635 = sst [smem:[#allocation25_spill]] %s2613_s0 }
   0x2   :  { %2636 = sst [smem:[#allocation26_spill]] %s2615_s2 }
   0x3   :  { %2637 = sst [smem:[#allocation27_spill]] %s2617_s4 }
   0x4   :  { %9 = vsyncpa [#allocation4], 0 }
   0x5   :  { %11 = vsyncpa [#allocation4 + $0x1], 0 }
   0x6   :  { %12 = vsyncpa [#allocation7], 0 }
   0x7   :  { %13 = vsyncpa [#allocation5], 0 }
   0x8   :  { %15 = vsyncpa [#allocation5 + $0x1], 0  ;;  %s1868_s15 = smov 0   ;;  %s1870_s16 = smov 0  }
   0x9   :  { %s1872_s17 = smov 0   ;;  %s1874_s18 = smov 0  }
   0xa   :  { %s1876_s19 = smov 0   ;;  %s1878_s20 = smov 0  }
   0xb   :  { %s1880_s21 = smov 0   ;;  %s1882_s22 = smov 0  }
   0xc   :  { %s1884_s23 = smov 0   ;;  %s1886_s24 = smov 0  }
   0xd   :  { %s1888_s25 = smov 0   ;;  %s1890_s26 = smov 0  }
   0xe   :  { %s1892_s27 = smov 0   ;;  %s1894_s28 = smov 0  }
   0xf LB: > { %2638 = sst [smem:[#allocation14_spill]] %s1796_s20  ;;  %s30_s29 = sadd.s32 1, %s1820_s26  ;;  %s1828_s28 = sphi %s1894_s28, %s21_s28   ;;  %s1824_s27 = sphi %s1892_s27, %s2686_s27   ;;  %s1820_s26 = sphi %s1890_s26, %s2685_s26   ;;  %s1816_s25 = sphi %s1888_s25, %s2695_s25   ;;  %s1812_s24 = sphi %s1886_s24, %s2694_s24   ;;  %s1808_s23 = sphi %s1884_s23, %s2682_s23   ;;  %s1804_s22 = sphi %s1882_s22, %s2693_s22   ;;  %s1800_s21 = sphi %s1880_s21, %s2692_s21   ;;  %s1796_s20 = sphi %s1878_s20, %s2680_s20   ;;  %s1792_s19 = sphi %s1876_s19, %s2691_s19   ;;  %s1788_s18 = sphi %s1874_s18, %s2690_s18   ;;  %s1784_s17 = sphi %s1872_s17, %s2689_s17   ;;  %s1780_s16 = sphi %s1870_s16, %s2688_s16   ;;  %s1776_s15 = sphi %s1868_s15, %s2687_s15  }
  0x10   : > { %2639 = sst [smem:[#allocation15_spill]] %s1808_s23  ;;  %s33_s30 = sadd.s32 1, %s1824_s27 }
  0x11   : > { %2640 = sst [smem:[#allocation16_spill]] %s1812_s24  ;;  %p31_p0 = scmp.ge.s32.totalorder %s30_s29, 4 }
  0x12   : > { %2641 = sst [smem:[#allocation17_spill]] %s1816_s25  ;;  %s40_s5 = sadd.s32 1, %s1808_s23 }
  0x13   : > { %2642 = sst [smem:[#allocation18_spill]] %s1820_s26  ;;  %p47_p1 = scmp.ne.s32.totalorder %s1808_s23, %s1804_s22 }
  0x14   : > { %2643 = sst [smem:[#allocation19_spill]] %s1824_s27  ;;  %p2622_p2 = scmp.eq.s32.totalorder %s1828_s28, 0 }
  0x15   : > { %s2697_s29 = smov (%p31_p0, %s30_s29), 0  ;;  %s2699_s30 = smov (!%p31_p0, %s33_s30), %s1824_s27 }
  0x16   : > { %2644 = sst [smem:[#allocation20_spill]] %s2697_s29  ;;  %p1949_p3 = por %p2622_p2, %p47_p1 }
  0x17   : > { %s1955_s7 = ssub.s32 %s1820_s26, %s2697_s29  ;;  %p35_p4 = scmp.ge.s32.totalorder %s2699_s30, 2 }
  0x18   : > { %p106_p5 = scmp.eq.s32.totalorder %s1955_s7, 0  ;;  %s136_s8 = sadd.s32 1, %s1784_s17 }
  0x19   : > { %s2701_s30 = smov (%p35_p4, %s2699_s30), 0  ;;  %p2621_p6 = scmp.lt.s32.totalorder %s1828_s28, 8 }
  0x1a   : > { %2646 = sst [smem:[#allocation21_spill]] %s2701_s30  ;;  %s37_s9 = ssub.s32 %s1824_s27, %s2701_s30 }
  0x1b   : > { %p38_p7 = scmp.eq.s32.totalorder %s37_s9, 0  ;;  %s133_s10 = sor.u32 %s1955_s7, %s37_s9 }
  0x1c   : > { %p134_p8 = scmp.eq.s32.totalorder %s133_s10, 0  ;;  %s189_s11 = sand.u32 1, %s1828_s28  }
  0x1d   : > { %s1967_s12 = scalar_select %p38_p7, %s1808_s23, %s40_s5  }
  0x1e   : > { %s1970_s13 = scalar_select %p134_p8, %s1784_s17, %s136_s8  }
  0x1f   : > { %2647 = sst [smem:[#allocation22_spill]] %s1967_s12  ;;  %s191_s14 = sand.u32 1, %s1808_s23  }
  0x20   : > { %2648 = sst [smem:[#allocation23_spill]] %s1970_s13  ;;  %s1165_s29 = sshll.u32 %s191_s14, 7 }
  0x21   : > { %s1184_s4 = sshll.u32 %s1824_s27, 11  ;;  %s2649_s0 = sld [smem:[#allocation25_spill]] }
  0x22   : > { %s193_s30 = scalar_lea.vmem [#allocation3], %s1165_s29  ;;  %p1983_p9 = pnand %p2621_p6, %p1949_p3 }
  0x23   : > { %s200_s9 = sshll.u32 %s193_s30, 4  ;;  %s1989_s8 = scalar_lea.sflag [#allocation4], %s189_s11  ;;  %s1987_s9 = int_to_ptr.vmem [resolvable:$true] %s200_s9 }
  0x24   : > { %p1588_p11 = pneg %p1983_p9 }
  0x27   : > { %s1977_s24 = scalar_lea.hbm %s2649_s0, %s1184_s4  ;;  %s1591_s29 = scalar_lea.hbm %s2649_s0, 4096 }
  0x28   : > { %s1586_s2 = scalar_lea.hbm %s1977_s24, 2048  ;;  %p1592_p0 = scmp.lt.u32.totalorder %s1977_s24, %s2649_s0 }
  0x29   : > { %p1587_p10 = scmp.ne.s32.totalorder %s1977_s24, %s1586_s2  ;;  %p1593_p1 = scmp.lt.u32.totalorder %s1591_s29, %s1586_s2 }
  0x2a   : > { %p1595_p4 = scmp.lt.u32.totalorder %s1586_s2, %s1977_s24 }
  0x2b   : > { %p1589_p12 = pnand %p1588_p11, %p1587_p10  ;;  %p1594_p3 = por %p1593_p1, %p1592_p0 }
  0x2d   : > { %p1590_p13 = pneg %p1589_p12  ;;  %p1596_p7 = por %p1595_p4, %p1594_p3 }
  0x2f   : > { %p1597_p8 = pnand %p1596_p7, %p1590_p13 }
  0x31   : > { %1600 = shalt.err (!%p1597_p8)
}
  0x32   : > { %s1601_s10 = scalar_lea.vmem %s1987_s9, 2048  ;;  %s1830_s11 = smov [#allocation3]  }
  0x33   : > { %p1602_p10 = scmp.ne.s32.totalorder %s1987_s9, %s1601_s10  ;;  %s1606_s14 = sshll.u32 %s1830_s11, 4  ;;  %s1607_s14 = int_to_ptr.vmem [resolvable:$false] %s1606_s14 }
  0x34   : > { %s1608_s4 = scalar_lea.vmem %s1607_s14, 4096  ;;  %p1609_p2 = scmp.lt.s32.totalorder %s1987_s9, %s1607_s14 }
  0x35   : > { %p1604_p12 = pnand %p1602_p10, %p1588_p11  ;;  %p1610_p0 = scmp.lt.s32.totalorder %s1608_s4, %s1601_s10 }
  0x37   : > { %p1605_p6 = pneg %p1604_p12  ;;  %p1611_p1 = por %p1610_p0, %p1609_p2 }
  0x39   : > { %p1612_p3 = pnand %p1611_p1, %p1605_p6 }
  0x3b   : > { %1615 = shalt.err (!%p1612_p3)
}
  0x3c   : > { %s2623_s2 = smov 128   ;;  %s2624_s25 = smov 8  }
  0x3d   : > { %1388 = dma.hbm_to_vmem [thread:$0]  (!%p1983_p9), %s1977_s24, 2048, %s1987_s9, %s1989_s8, %s2623_s2, %s2623_s2, %s2624_s25  }
  0x3e   : > { %s2021_s29 = sadd.s32 4294967295, %s1828_s28   ;;  %s1161_s30 = sadd.s32 4294967294, %s1828_s28  }
  0x3f   : > { %p53_p2 = scmp.ne.s32.totalorder %s1804_s22, %s1800_s21  ;;  %p2629_p6 = scmp.eq.s32.totalorder %s2021_s29, 0 }
  0x40   : > { %s108_s6 = sadd.s32 1, %s1796_s20  ;;  %p115_p11 = scmp.ne.s32.totalorder %s1796_s20, %s1792_s19 }
  0x41   : > { %p2032_p13 = por %p2629_p6, %p53_p2  ;;  %p121_p4 = scmp.ne.s32.totalorder %s1792_s19, %s1788_s18 }
  0x42   : > { %s2041_s24 = scalar_select %p106_p5, %s1796_s20, %s108_s6  }
  0x43   : > { %s2651_s5 = scalar_select %p2032_p13, 1, 0 }
  0x44   : > { %2652 = sst [smem:[#allocation24_spill]] %s2041_s24  ;;  %p2653_p9 = scmp.eq.s32.totalorder %s1828_s28, 0 }
  0x45   : > { %p2051_p8 = por %p121_p4, %p2629_p6  ;;  %p146_p10 = scmp.ne.s32.totalorder %s1784_s17, %s1780_s16 }
  0x46   : > { %p2045_p7 = por %p115_p11, %p2653_p9  ;;  %p147_p12 = scmp.eq.s32.totalorder %s2021_s29, 7 }
  0x47   : > { %s2655_s21 = scalar_select %p2051_p8, 1, 0 }
  0x48   : > { %p152_p0 = scmp.ne.s32.totalorder %s1780_s16, %s1776_s15  ;;  %p153_p1 = scmp.eq.s32.totalorder %s1161_s30, 7 }
  0x49   : > { %p2060_p5 = por %p147_p12, %p146_p10  ;;  %p1162_p3 = scmp.ge.s32.totalorder %s1828_s28, 1 }
  0x4a   : > { %p2065_p2 = por %p153_p1, %p152_p0  ;;  %p160_p11 = scmp.lt.s32.totalorder %s1828_s28, 9 }
  0x4b   : > { %s2656_s18 = scalar_select %p2060_p5, 1, 0 }
  0x4c   : > { %s2657_s7 = scalar_select %p2065_p2, 1, 0 }
  0x4d   : > { %p2070_p4 = pnand %p1162_p3, %p160_p11  ;;  %s1833_s11 = smov [#allocation6]  }
  0x4e   : > { %s172_s14 = sshll.u32 %s1833_s11, 4  ;;  %p2659_p9 = scmp.lt.s32.totalorder %s1828_s28, 8  ;;  %s2074_s14 = int_to_ptr.vmem [resolvable:$true] %s172_s14 }
  0x4f   : > { %s2658_s10 = scalar_select %p2070_p4, 1, 0 }
  0x50   : > { %p2080_p10 = pnand %p2659_p9, %p2045_p7  ;;  %p1381_p12 = pneg %p2070_p4 }
  0x51   : > { %s212_s30 = sand.u32 1, %s1796_s20   ;;  %s1185_s25 = sshll.u32 %s1820_s26, 8 }
  0x52   : > { %s2660_s4 = scalar_select %p2080_p10, 1, 0 }
  0x53   : > { %s1168_s6 = sshll.u32 %s212_s30, 8  ;;  %p2089_p0 = pnand %p1381_p12, %p2629_p6 }
  0x54   : > { %s214_s11 = scalar_lea.vmem [#allocation8], %s1168_s6  ;;  %s2097_s12 = scalar_lea.hbm %s2616_s3, %s1185_s25 }
  0x55   : > { %s221_s0 = sshll.u32 %s214_s11, 4  ;;  %s1616_s13 = scalar_lea.hbm %s2614_s1, 2048  ;;  %s2123_s0 = int_to_ptr.vmem [resolvable:$true] %s221_s0 }
  0x56   : > { %p1617_p7 = scmp.ne.s32.totalorder %s2614_s1, %s1616_s13  ;;  %p1618_p1 = pneg %p2089_p0 }
  0x57   : > { %p1623_p9 = scmp.lt.u32.totalorder %s1616_s13, %s2614_s1 }
  0x58   : > { %p1619_p3 = pnand %p1618_p1, %p1617_p7 }
  0x5a   : > { %p1620_p11 = pneg %p1619_p3 }
  0x5c   : > { %p1625_p12 = pnand %p1623_p9, %p1620_p11 }
  0x5e   : > { %1628 = shalt.err (!%p1625_p12)
}
  0x5f   : > { %s1629_s27 = scalar_lea.vmem %s2074_s14, 2048  ;;  %p1637_p8 = scmp.lt.s32.totalorder %s2074_s14, %s2074_s14 }
  0x60   : > { %p1630_p6 = scmp.ne.s32.totalorder %s2074_s14, %s1629_s27  ;;  %p1638_p13 = scmp.lt.s32.totalorder %s1629_s27, %s1629_s27 }
  0x62   : > { %p1632_p2 = pnand %p1630_p6, %p1618_p1  ;;  %p1639_p4 = por %p1638_p13, %p1637_p8 }
  0x64   : > { %p1633_p5 = pneg %p1632_p2 }
  0x66   : > { %p1640_p10 = pnand %p1639_p4, %p1633_p5 }
  0x68   : > { %1643 = shalt.err (!%p1640_p10)
}
  0x69   : > { %s2662_s20 = smov 8   ;;  %s2663_s23 = smov 128  }
  0x6a   : > { %1384 = dma.hbm_to_vmem [thread:$0]  (!%p2089_p0), %s2614_s1, 2048, %s2074_s14, [#allocation7], %s2663_s23, %s2663_s23, %s2662_s20  }
  0x6b   : > { %s1644_s25 = scalar_lea.hbm %s2097_s12, 4096  ;;  %p2664_p13 = scmp.ne.s32.totalorder %s2660_s4, 0 }
  0x6c   : > { %p1645_p6 = scmp.ne.s32.totalorder %s2097_s12, %s1644_s25  ;;  %s1649_s11 = scalar_lea.hbm %s2616_s3, 16384 }
  0x6d   : > { %p1646_p8 = pneg %p2664_p13  ;;  %p1650_p4 = scmp.lt.u32.totalorder %s2097_s12, %s2616_s3 }
  0x6e   : > { %p1651_p10 = scmp.lt.u32.totalorder %s1649_s11, %s1644_s25  ;;  %p1653_p7 = scmp.lt.u32.totalorder %s1644_s25, %s2097_s12 }
  0x6f   : > { %p1647_p5 = pnand %p1646_p8, %p1645_p6 }
  0x70   : > { %p1652_p0 = por %p1651_p10, %p1650_p4 }
  0x71   : > { %p1648_p2 = pneg %p1647_p5 }
  0x72   : > { %p1654_p1 = por %p1653_p7, %p1652_p0 }
  0x74   : > { %p1655_p3 = pnand %p1654_p1, %p1648_p2 }
  0x76   : > { %1658 = shalt.err (!%p1655_p3)
}
  0x77   : > { %s1659_s14 = scalar_lea.vmem %s2123_s0, 4096  ;;  %s1834_s6 = smov [#allocation8]  }
  0x78   : > { %p1660_p11 = scmp.ne.s32.totalorder %s2123_s0, %s1659_s14  ;;  %s1664_s27 = sshll.u32 %s1834_s6, 4  ;;  %s1665_s27 = int_to_ptr.vmem [resolvable:$false] %s1664_s27 }
  0x79   : > { %s1666_s20 = scalar_lea.vmem %s1665_s27, 8192  ;;  %p1667_p6 = scmp.lt.s32.totalorder %s2123_s0, %s1665_s27 }
  0x7a   : > { %p1662_p9 = pnand %p1660_p11, %p1646_p8  ;;  %p1668_p5 = scmp.lt.s32.totalorder %s1666_s20, %s1659_s14 }
  0x7c   : > { %p1663_p12 = pneg %p1662_p9  ;;  %p1669_p4 = por %p1668_p5, %p1667_p6 }
  0x7e   : > { %p1670_p10 = pnand %p1669_p4, %p1663_p12 }
  0x80   : > { %1673 = shalt.err (!%p1670_p10)
}
  0x81   : > { %s1835_s23 = smov 1024   ;;  %s1836_s26 = smov 256  }
  0x82   : > { %s1837_s13 = smov 16   ;;  %p2665_p8 = scmp.ne.s32.totalorder %s2658_s10, 0 }
  0x83   : > { %1391 = dma.hbm_to_vmem [thread:$0]  (!%p2664_p13), %s2097_s12, 4096, %s2123_s0, %s1989_s8, %s1835_s23, %s1836_s26, %s1837_s13  }
  0x84   : > { %233 = sbr.rel (%p2665_p8) target bundleno = 1057 (0x421), region = 36  ;;  %s235_s25 = sand.u32 (!%p2665_p8), 1, %s2021_s29  }
  0x85   : > { %s237_s2 = sand.u32 (!%p2665_p8), 1, %s1804_s22   ;;  %s236_s11 = scalar_lea.sflag (!%p2665_p8), [#allocation4], %s235_s25 }
  0x86   : > { %s1172_s24 = sshll.u32 (!%p2665_p8), %s237_s2, 7  ;;  %p2666_p2 = scmp.ne.s32.totalorder (!%p2665_p8), %s2651_s5, 0 }
  0x87   : > { %s2155_s9 = scalar_lea.vmem (!%p2665_p8), [#allocation3], %s1172_s24 }
  0x8b   : > { %1759 = dma.done.wait (%p2666_p2), %s236_s11, 2048  }
  0x8c   : > { %1761 = vsyncadd (%p2666_p2), %s236_s11, 4294965248  ;;  %p2667_p0 = scmp.eq.s32.totalorder %s2021_s29, 0 }
  0x8e   : > { %1763 = dma.done.wait (%p2667_p0), [#allocation7], 2048   ;;  %p2668_p13 = pmov %p2667_p0 }
  0x8f   : > { %s250_s0 = sand.u32 1, %s1792_s19   ;;  %p2669_p7 = scmp.ne.s32.totalorder %s2655_s21, 0 }
  0x90   : > { %1765 = vsyncadd (%p2668_p13), [#allocation7], 4294965248  ;;  %s1174_s12 = sshll.u32 %s250_s0, 8 }
  0x91   : > { %s2166_s8 = scalar_lea.vmem [#allocation8], %s1174_s12 }
  0x92   : > { %1767 = dma.done.wait (%p2669_p7), %s236_s11, 4096  }
  0x93   : > { %1769 = vsyncadd (%p2669_p7), %s236_s11, 4294963200  ;;  %s279_s5 = sand.u32 1, %s1780_s16   ;;  %s2670_s29 = sld [smem:[#allocation16_spill]] }
  0x94   : > { %s1175_s10 = sshll.u32 %s279_s5, 8 }
  0x95   : > { %s2175_s4 = scalar_lea.vmem [#allocation9], %s1175_s10 }
  0x99   : > { %p1176_p1 = scmp.ne.s32.totalorder %s2670_s29, 0 }
  0x9a   : > { %v306_v0 = vld [vmem:[#allocation6] sm:$0xff] (!%p1176_p1)  ;;  %v307_v1 = vld [vmem:[#allocation6 + $0x8] sm:$0xff] (!%p1176_p1)  ;;  %v308_v2 = vld [vmem:[#allocation6 + $0x10] sm:$0xff] (!%p1176_p1)  ;;  %v323_v40 = vlaneseq (!%p1176_p1)  ;;  %s2671_s14 = sld [smem:[#allocation26_spill]] (!%p1176_p1) }
  0x9b   : > { %289 = sbr.rel (%p1176_p1) target bundleno = 765 (0x2fd), region = 52  ;;  %v1275_v3 = vpack.c.bf16 (!%p1176_p1), %v307_v1, %v306_v0  ;;  %v309_v4 = vld [vmem:[#allocation6 + $0x18] sm:$0xff] (!%p1176_p1)  ;;  %v310_v6 = vld [vmem:[#allocation6 + $0x20] sm:$0xff] (!%p1176_p1)  ;;  %v311_v7 = vld [vmem:[#allocation6 + $0x28] sm:$0xff] (!%p1176_p1) }
  0x9c   : > { %v1279_v5 = vpack.c.bf16 (!%p1176_p1), %v309_v4, %v308_v2  ;;  %v1283_v8 = vpack.c.bf16 (!%p1176_p1), %v311_v7, %v310_v6  ;;  %v290_v9 = vld [vmem:[%s2155_s9] sm:$0xff] (!%p1176_p1)  ;;  %v312_v11 = vld [vmem:[#allocation6 + $0x30] sm:$0xff] (!%p1176_p1)  ;;  %v313_v12 = vld [vmem:[#allocation6 + $0x38] sm:$0xff] (!%p1176_p1)  ;;  %v2194_v41 = vshrl.u32 (!%p1176_p1), %v323_v40, 7 }
  0x9d   : > { %1276 = vmatprep.subr.bf16.mxu0 (!%p1176_p1), %v1275_v3  ;;  %1339 = vmatprep.subr.bf16.mxu1 (!%p1176_p1), %v1275_v3  ;;  %v298_v10 = vld [vmem:[%s2155_s9 + $0x40] sm:$0xff] (!%p1176_p1)  ;;  %v1287_v13 = vpack.c.bf16 (!%p1176_p1), %v313_v12, %v312_v11  ;;  %v315_v15 = vld [vmem:[#allocation6 + $0x48] sm:$0xff] (!%p1176_p1)  ;;  %v316_v17 = vld [vmem:[#allocation6 + $0x50] sm:$0xff] (!%p1176_p1) }
  0x9e   : > { %1278 = vmatpush3.bf16.msra.mxu0 (!%p1176_p1), %v1275_v3  ;;  %1347 = vmatpush3.bf16.msra.mxu1 (!%p1176_p1), %v1275_v3  ;;  %v314_v14 = vld [vmem:[#allocation6 + $0x40] sm:$0xff] (!%p1176_p1)  ;;  %v317_v18 = vld [vmem:[#allocation6 + $0x58] sm:$0xff] (!%p1176_p1)  ;;  %v319_v21 = vld [vmem:[#allocation6 + $0x68] sm:$0xff] (!%p1176_p1)  ;;  %v325_v42 = vsub.s32 (!%p1176_p1), 0, %v2194_v41 }
  0x9f   : > { %1280 = vmatprep.subr.bf16.mxu0 (!%p1176_p1), %v1279_v5  ;;  %1340 = vmatprep.subr.bf16.mxu1 (!%p1176_p1), %v1279_v5  ;;  %v1291_v16 = vpack.c.bf16 (!%p1176_p1), %v315_v15, %v314_v14  ;;  %v1295_v19 = vpack.c.bf16 (!%p1176_p1), %v317_v18, %v316_v17  ;;  %v318_v20 = vld [vmem:[#allocation6 + $0x60] sm:$0xff] (!%p1176_p1)  ;;  %v320_v23 = vld [vmem:[#allocation6 + $0x70] sm:$0xff] (!%p1176_p1)  ;;  %v321_v24 = vld [vmem:[#allocation6 + $0x78] sm:$0xff] (!%p1176_p1) }
  0xa0   : > { %1251 = vmatprep.mubr.f32.mxu0 (!%p1176_p1), %v290_v9  ;;  %1263 = vmatprep.mubr.f32.mxu1 (!%p1176_p1), %v298_v10  ;;  %v1299_v22 = vpack.c.bf16 (!%p1176_p1), %v319_v21, %v318_v20  ;;  %v1303_v25 = vpack.c.bf16 (!%p1176_p1), %v321_v24, %v320_v23  ;;  %v291_v26 = vld [vmem:[%s2155_s9 + $0x8] sm:$0xff] (!%p1176_p1)  ;;  %v292_v28 = vld [vmem:[%s2155_s9 + $0x10] sm:$0xff] (!%p1176_p1)  ;;  %v293_v30 = vld [vmem:[%s2155_s9 + $0x18] sm:$0xff] (!%p1176_p1) }
  0xa1   : > { %v299_v27 = vld [vmem:[%s2155_s9 + $0x48] sm:$0xff] (!%p1176_p1)  ;;  %v300_v29 = vld [vmem:[%s2155_s9 + $0x50] sm:$0xff] (!%p1176_p1)  ;;  %v301_v31 = vld [vmem:[%s2155_s9 + $0x58] sm:$0xff] (!%p1176_p1) }
  0xa2   : > { %1282 = vmatpush3.bf16.msra.mxu0 %v1279_v5  ;;  %1348 = vmatpush3.bf16.msra.mxu1 %v1279_v5  ;;  %v294_v32 = vld [vmem:[%s2155_s9 + $0x20] sm:$0xff]  ;;  %v295_v34 = vld [vmem:[%s2155_s9 + $0x28] sm:$0xff]  ;;  %v296_v36 = vld [vmem:[%s2155_s9 + $0x30] sm:$0xff] }
  0xa3   : > { %1284 = vmatprep.subr.bf16.mxu0 %v1283_v8  ;;  %1341 = vmatprep.subr.bf16.mxu1 %v1283_v8  ;;  %v302_v33 = vld [vmem:[%s2155_s9 + $0x60] sm:$0xff]  ;;  %v303_v35 = vld [vmem:[%s2155_s9 + $0x68] sm:$0xff]  ;;  %v304_v37 = vld [vmem:[%s2155_s9 + $0x70] sm:$0xff] }
  0xa4   : > { %v297_v38 = vld [vmem:[%s2155_s9 + $0x38] sm:$0xff]  ;;  %v2200_v43 = vld [vmem:[%s2671_s14] sm:$0x7] }
  0xa5   : > { %v305_v39 = vld [vmem:[%s2155_s9 + $0x78] sm:$0xff]  ;;  %v2203_v44 = vrot.slane %v2200_v43, %v325_v42 }
  0xa6   : > { %1286 = vmatpush3.bf16.msra.mxu0 %v1283_v8  ;;  %1349 = vmatpush3.bf16.msra.mxu1 %v1283_v8 }
  0xa7   : > { %1288 = vmatprep.subr.bf16.mxu0 %v1287_v13  ;;  %1342 = vmatprep.subr.bf16.mxu1 %v1287_v13 }
  0xaa   : > { %1290 = vmatpush3.bf16.msra.mxu0 %v1287_v13  ;;  %1350 = vmatpush3.bf16.msra.mxu1 %v1287_v13 }
  0xab   : > { %1292 = vmatprep.subr.bf16.mxu0 %v1291_v16  ;;  %1343 = vmatprep.subr.bf16.mxu1 %v1291_v16 }
  0xae   : > { %1294 = vmatpush3.bf16.msra.mxu0 %v1291_v16  ;;  %1351 = vmatpush3.bf16.msra.mxu1 %v1291_v16 }
  0xaf   : > { %1296 = vmatprep.subr.bf16.mxu0 %v1295_v19  ;;  %1344 = vmatprep.subr.bf16.mxu1 %v1295_v19 }
  0xb2   : > { %1298 = vmatpush3.bf16.msra.mxu0 %v1295_v19  ;;  %1352 = vmatpush3.bf16.msra.mxu1 %v1295_v19 }
  0xb3   : > { %1300 = vmatprep.subr.bf16.mxu0 %v1299_v22  ;;  %1345 = vmatprep.subr.bf16.mxu1 %v1299_v22 }
  0xb6   : > { %1302 = vmatpush3.bf16.msra.mxu0 %v1299_v22  ;;  %1353 = vmatpush3.bf16.msra.mxu1 %v1299_v22 }
  0xb7   : > { %1304 = vmatprep.subr.bf16.mxu0 %v1303_v25  ;;  %1346 = vmatprep.subr.bf16.mxu1 %v1303_v25 }
  0xba   : > { %1306 = vmatpush3.bf16.msra.mxu0 %v1303_v25  ;;  %1354 = vmatpush3.bf16.msra.mxu1 %v1303_v25 }
  0xbd   : > { %1252 = vmatmul.mubr.f32.vlgmr.msra.gmra.mrb[0].mxu0 %v291_v26  ;;  %1264 = vmatmul.mubr.f32.vlgmr.msra.gmra.mrb[0].mxu1 %v299_v27 }
  0xbe   : > { %1254 = vmatprep.mubr.f32.mxu0 %v292_v28  ;;  %1266 = vmatprep.mubr.f32.mxu1 %v300_v29 }
  0xc1   : > { %1255 = vmatmul.mubr.f32.gmra.mrb[2].mxu0 %v293_v30  ;;  %1267 = vmatmul.mubr.f32.gmra.mrb[2].mxu1 %v301_v31 }
  0xc2   : > { %1257 = vmatprep.mubr.f32.mxu0 %v294_v32  ;;  %1269 = vmatprep.mubr.f32.mxu1 %v302_v33 }
  0xc5   : > { %1258 = vmatmul.mubr.f32.gmra.mrb[4].mxu0 %v295_v34  ;;  %1270 = vmatmul.mubr.f32.gmra.mrb[4].mxu1 %v303_v35 }
  0xc6   : > { %1260 = vmatprep.mubr.f32.mxu0 %v296_v36  ;;  %1272 = vmatprep.mubr.f32.mxu1 %v304_v37 }
  0xc9   : > { %1261 = vmatmul.mubr.f32.gmra.mrb[6].mxu0 %v297_v38  ;;  %1273 = vmatmul.mubr.f32.gmra.mrb[6].mxu1 %v305_v39 }
 0x190   : > { %v1253_v45 = vpop.f32.mrb[0].mxu0  ;;  %v1265_v46 = vpop.f32.mrb[0].mxu1 }
 0x191   : > { %v399_v47 = vadd.f32 %v1253_v45, %v2203_v44  ;;  %v439_v48 = vadd.f32 %v1265_v46, %v2203_v44  ;;  %v393_v49 = vpop.f32.mrb[1].mxu0  ;;  %v433_v50 = vpop.f32.mrb[1].mxu1 }
 0x192   : > { %v394_v51 = vadd.f32 %v393_v49, %v2203_v44  ;;  %v2209_v52 = vadd.f32 %v433_v50, %v2203_v44 }
 0x193   : > { %v489_v53 = vmul.f32 0.70710677, %v399_v47  ;;  %v497_v54 = vmul.f32 0.70710677, %v439_v48  ;;  %v473_v23 = vmul.f32 0.5, %v399_v47  ;;  %v481_v27 = vmul.f32 0.5, %v439_v48 }
 0x194   : > { %v488_v55 = vmul.f32 0.70710677, %v394_v51  ;;  %v496_v56 = vmul.f32 0.70710677, %v2209_v52  ;;  %v1256_v57 = vpop.f32.mrb[2].mxu0  ;;  %v1268_v58 = vpop.f32.mrb[2].mxu1 }
 0x195   : > { %1522 = verf.f32 %v489_v53  ;;  %v409_v59 = vadd.f32 %v1256_v57, %v2203_v44  ;;  %v2214_v60 = vadd.f32 %v1268_v58, %v2203_v44  ;;  %v403_v61 = vpop.f32.mrb[3].mxu0  ;;  %v443_v62 = vpop.f32.mrb[3].mxu1  ;;  %v472_v34 = vmul.f32 0.5, %v394_v51 }
 0x196   : > { %1524 = verf.f32 %v497_v54  ;;  %v2217_v63 = vadd.f32 %v443_v62, %v2203_v44  ;;  %v2220_v1 = vadd.f32 %v403_v61, %v2203_v44  ;;  %v480_v50 = vmul.f32 0.5, %v2209_v52 }
 0x197   : > { %1526 = verf.f32 %v488_v55  ;;  %v491_v0 = vmul.f32 0.70710677, %v409_v59  ;;  %v499_v4 = vmul.f32 0.70710677, %v2214_v60  ;;  %v475_v35 = vmul.f32 0.5, %v409_v59 }
 0x198   : > { %v1259_v2 = vpop.f32.mrb[4].mxu0  ;;  %v1271_v3 = vpop.f32.mrb[4].mxu1  ;;  %1528 = verf.f32 %v496_v56  ;;  %v498_v5 = vmul.f32 0.70710677, %v2217_v63  ;;  %v490_v9 = vmul.f32 0.70710677, %v2220_v1 }
 0x199   : > { %1530 = verf.f32 %v491_v0  ;;  %v413_v6 = vpop.f32.mrb[5].mxu0  ;;  %v453_v7 = vpop.f32.mrb[5].mxu1  ;;  %v2229_v10 = vadd.f32 %v1259_v2, %v2203_v44  ;;  %v2237_v20 = vadd.f32 %v1271_v3, %v2203_v44  ;;  %v483_v55 = vmul.f32 0.5, %v2214_v60 }
 0x19a   : > { %v2225_v8 = vadd.f32 %v413_v6, %v2203_v44  ;;  %1532 = verf.f32 %v499_v4  ;;  %v2233_v15 = vadd.f32 %v453_v7, %v2203_v44  ;;  %v474_v0 = vmul.f32 0.5, %v2220_v1 }
 0x19b   : > { %1534 = verf.f32 %v498_v5  ;;  %v493_v19 = vmul.f32 0.70710677, %v2229_v10  ;;  %v501_v32 = vmul.f32 0.70710677, %v2237_v20  ;;  %v477_v7 = vmul.f32 0.5, %v2229_v10 }
 0x19c   : > { %v1262_v11 = vpop.f32.mrb[6].mxu0  ;;  %v1274_v12 = vpop.f32.mrb[6].mxu1  ;;  %v492_v14 = vmul.f32 0.70710677, %v2225_v8  ;;  %1536 = verf.f32 %v490_v9  ;;  %v500_v24 = vmul.f32 0.70710677, %v2233_v15 }
 0x19d   : > { %v423_v13 = vpop.f32.mrb[7].mxu0  ;;  %v463_v16 = vpop.f32.mrb[7].mxu1  ;;  %v2247_v33 = vadd.f32 %v1262_v11, %v2203_v44  ;;  %v469_v49 = vadd.f32 %v1274_v12, %v2203_v44  ;;  %v476_v4 = vmul.f32 0.5, %v2225_v8  ;;  %v484_v9 = vmul.f32 0.5, %v2233_v15 }
 0x19e   : > { %1538 = verf.f32 %v492_v14  ;;  %v2241_v25 = vadd.f32 %v423_v13, %v2203_v44  ;;  %v464_v40 = vadd.f32 %v463_v16, %v2203_v44  ;;  %v482_v44 = vmul.f32 0.5, %v2217_v63 }
 0x19f   : > { %v1523_v17 = vpop.eup %1522  ;;  %1540 = verf.f32 %v493_v19  ;;  %v495_v48 = vmul.f32 0.70710677, %v2247_v33  ;;  %v503_v59 = vmul.f32 0.70710677, %v469_v49  ;;  %v485_v13 = vmul.f32 0.5, %v2237_v20 }
 0x1a0   : > { %v1525_v18 = vpop.eup %1524  ;;  %v521_v21 = vadd.f32 1.0, %v1523_v17  ;;  %1542 = verf.f32 %v500_v24  ;;  %v494_v39 = vmul.f32 0.70710677, %v2241_v25  ;;  %v502_v54 = vmul.f32 0.70710677, %v464_v40 }
 0x1a1   : > { %v1527_v22 = vpop.eup %1526  ;;  %v529_v28 = vadd.f32 1.0, %v1525_v18  ;;  %1544 = verf.f32 %v501_v32  ;;  %v478_v17 = vmul.f32 0.5, %v2241_v25  ;;  %v479_v19 = vmul.f32 0.5, %v2247_v33 }
 0x1a2   : > { %v1529_v26 = vpop.eup %1528  ;;  %v2243_v29 = vmul.f32 %v521_v21, %v473_v23  ;;  %v520_v30 = vadd.f32 1.0, %v1527_v22  ;;  %1546 = verf.f32 %v494_v39  ;;  %v486_v23 = vmul.f32 0.5, %v464_v40 }
 0x1a3   : > { %v1531_v31 = vpop.eup %1530  ;;  %v2249_v36 = vmul.f32 %v529_v28, %v481_v27  ;;  %v528_v46 = vadd.f32 1.0, %v1529_v26  ;;  %1548 = verf.f32 %v495_v48  ;;  %v487_v26 = vmul.f32 0.5, %v469_v49 }
 0x1a4   : > { %554 = vadd.xlane.f32.xlu0 %v2243_v29  ;;  %v523_v37 = vadd.f32 1.0, %v1531_v31  ;;  %v1533_v38 = vpop.eup %1532  ;;  %v2257_v45 = vmul.f32 %v520_v30, %v472_v34  ;;  %1550 = verf.f32 %v502_v54 }
 0x1a5   : > { %570 = vadd.xlane.f32.xlu1 %v2249_v36  ;;  %v1535_v47 = vpop.eup %1534  ;;  %v531_v51 = vadd.f32 1.0, %v1533_v38  ;;  %v2265_v56 = vmul.f32 %v528_v46, %v480_v50  ;;  %1552 = verf.f32 %v503_v59 }
 0x1a6   : > { %v2255_v42 = vmul.f32 %v523_v37, %v475_v35  ;;  %v1537_v53 = vpop.eup %1536  ;;  %v530_v57 = vadd.f32 1.0, %v1535_v47 }
 0x1a7   : > { %v2268_v61 = vmul.f32 %v531_v51, %v483_v55  ;;  %v522_v52 = vadd.f32 1.0, %v1537_v53 }
 0x1a8   : > { %552 = vadd.xlane.f32.xlu0 %v2257_v45  ;;  %v1539_v58 = vpop.eup %1538  ;;  %v2273_v60 = vmul.f32 %v530_v57, %v482_v44 }
 0x1a9   : > { %558 = vadd.xlane.f32.xlu1 %v2255_v42  ;;  %v1541_v62 = vpop.eup %1540  ;;  %v524_v2 = vadd.f32 1.0, %v1539_v58  ;;  %v2276_v5 = vmul.f32 %v522_v52, %v474_v0 }
 0x1aa   : > { %v1543_v3 = vpop.eup %1542  ;;  %v525_v63 = vadd.f32 1.0, %v1541_v62 }
 0x1ab   : > { %v1545_v6 = vpop.eup %1544  ;;  %v2282_v1 = vmul.f32 %v524_v2, %v476_v4  ;;  %v532_v11 = vadd.f32 1.0, %v1543_v3 }
 0x1ac   : > { %568 = vadd.xlane.f32.xlu0 %v2265_v56  ;;  %v1547_v12 = vpop.eup %1546  ;;  %v2285_v14 = vmul.f32 %v525_v63, %v477_v7  ;;  %v533_v8 = vadd.f32 1.0, %v1545_v6 }
 0x1ad   : > { %574 = vadd.xlane.f32.xlu1 %v2268_v61  ;;  %v1549_v16 = vpop.eup %1548  ;;  %v2290_v10 = vmul.f32 %v532_v11, %v484_v9  ;;  %v526_v15 = vadd.f32 1.0, %v1547_v12 }
 0x1ae   : > { %v1551_v18 = vpop.eup %1550  ;;  %v2293_v21 = vmul.f32 %v533_v8, %v485_v13  ;;  %v527_v20 = vadd.f32 1.0, %v1549_v16 }
 0x1af   : > { %v1553_v22 = vpop.eup %1552  ;;  %v2297_v24 = vmul.f32 %v526_v15, %v478_v17  ;;  %v534_v25 = vadd.f32 1.0, %v1551_v18 }
 0x1b0   : > { %572 = vadd.xlane.f32.xlu0 %v2273_v60  ;;  %v2299_v27 = vmul.f32 %v527_v20, %v479_v19  ;;  %v535_v28 = vadd.f32 1.0, %v1553_v22 }
 0x1b1   : > { %556 = vadd.xlane.f32.xlu1 %v2276_v5  ;;  %v2303_v30 = vmul.f32 %v534_v25, %v486_v23 }
 0x1b2   : > { %v2305_v31 = vmul.f32 %v535_v28, %v487_v26 }
 0x1b4   : > { %560 = vadd.xlane.f32.xlu0 %v2282_v1 }
 0x1b5   : > { %562 = vadd.xlane.f32.xlu1 %v2285_v14 }
 0x1b8   : > { %576 = vadd.xlane.f32.xlu0 %v2290_v10 }
 0x1b9   : > { %578 = vadd.xlane.f32.xlu1 %v2293_v21 }
 0x1bc   : > { %564 = vadd.xlane.f32.xlu0 %v2297_v24 }
 0x1bd   : > { %566 = vadd.xlane.f32.xlu1 %v2299_v27 }
 0x1c0   : > { %580 = vadd.xlane.f32.xlu0 %v2303_v30 }
 0x1c1   : > { %582 = vadd.xlane.f32.xlu1 %v2305_v31 }
 0x231   : > { %v555_v32 = vpop.xlane.xlu0 %554 }
 0x232   : > { %v586_v33 = vmul.f32 0.0078125, %v555_v32  ;;  %v571_v34 = vpop.xlane.xlu1 %570 }
 0x233   : > { %v594_v35 = vmul.f32 0.0078125, %v571_v34 }
 0x234   : > { %v2310_v37 = vsub.f32 %v2243_v29, %v586_v33 }
 0x235   : > { %v553_v38 = vpop.xlane.xlu0 %552  ;;  %v2313_v39 = vsub.f32 %v2249_v36, %v594_v35 }
 0x236   : > { %v585_v40 = vmul.f32 0.0078125, %v553_v38  ;;  %v618_v46 = vmul.f32 %v2310_v37, %v2310_v37  ;;  %v559_v47 = vpop.xlane.xlu1 %558 }
 0x237   : > { %v588_v48 = vmul.f32 0.0078125, %v559_v47  ;;  %v626_v53 = vmul.f32 %v2313_v39, %v2313_v39 }
 0x238   : > { %v2318_v49 = vsub.f32 %v2257_v45, %v585_v40  ;;  %635 = vadd.xlane.f32.xlu1 %v618_v46 }
 0x239   : > { %v569_v50 = vpop.xlane.xlu0 %568  ;;  %v2321_v51 = vsub.f32 %v2255_v42, %v588_v48 }
 0x23a   : > { %v593_v29 = vmul.f32 0.0078125, %v569_v50  ;;  %v617_v36 = vmul.f32 %v2318_v49, %v2318_v49  ;;  %v575_v54 = vpop.xlane.xlu1 %574 }
 0x23b   : > { %v596_v55 = vmul.f32 0.0078125, %v575_v54  ;;  %v620_v42 = vmul.f32 %v2321_v51, %v2321_v51 }
 0x23c   : > { %v2328_v57 = vsub.f32 %v2265_v56, %v593_v29  ;;  %651 = vadd.xlane.f32.xlu1 %v626_v53  ;;  %633 = vadd.xlane.f32.xlu0 %v617_v36 }
 0x23d   : > { %v573_v45 = vpop.xlane.xlu0 %572  ;;  %v2331_v58 = vsub.f32 %v2268_v61, %v596_v55 }
 0x23e   : > { %v625_v59 = vmul.f32 %v2328_v57, %v2328_v57  ;;  %v557_v44 = vpop.xlane.xlu1 %556  ;;  %v595_v62 = vmul.f32 0.0078125, %v573_v45  ;;  %v731_v45 = vsub.s32 1, %v2194_v41 }
 0x23f   : > { %v587_v52 = vmul.f32 0.0078125, %v557_v44  ;;  %v628_v2 = vmul.f32 %v2331_v58, %v2331_v58  ;;  %v751_v44 = vsub.s32 2, %v2194_v41 }
 0x240   : > { %639 = vadd.xlane.f32.xlu1 %v620_v42  ;;  %649 = vadd.xlane.f32.xlu0 %v625_v59  ;;  %v2343_v3 = vsub.f32 %v2273_v60, %v595_v62 }
 0x241   : > { %v561_v0 = vpop.xlane.xlu0 %560  ;;  %v2338_v56 = vsub.f32 %v2276_v5, %v587_v52 }
 0x242   : > { %v563_v61 = vpop.xlane.xlu1 %562  ;;  %v589_v63 = vmul.f32 0.0078125, %v561_v0  ;;  %v627_v8 = vmul.f32 %v2343_v3, %v2343_v3  ;;  %v2392_v0 = vrot.slane %v2200_v43, %v731_v45 }
 0x243   : > { %v590_v4 = vmul.f32 0.0078125, %v563_v61  ;;  %v619_v6 = vmul.f32 %v2338_v56, %v2338_v56 }
 0x244   : > { %655 = vadd.xlane.f32.xlu1 %v628_v2  ;;  %v2351_v12 = vsub.f32 %v2282_v1, %v589_v63 }
 0x245   : > { %v577_v7 = vpop.xlane.xlu0 %576  ;;  %v2348_v9 = vsub.f32 %v2285_v14, %v590_v4  ;;  %637 = vadd.xlane.f32.xlu0 %v619_v6  ;;  %v2395_v6 = vrot.slane %v2200_v43, %v751_v44 }
 0x246   : > { %v579_v5 = vpop.xlane.xlu1 %578  ;;  %v597_v11 = vmul.f32 0.0078125, %v577_v7  ;;  %v621_v20 = vmul.f32 %v2351_v12, %v2351_v12 }
 0x247   : > { %v598_v13 = vmul.f32 0.0078125, %v579_v5  ;;  %v622_v60 = vmul.f32 %v2348_v9, %v2348_v9 }
 0x248   : > { %v2361_v14 = vsub.f32 %v2290_v10, %v597_v11 }
 0x249   : > { %v565_v16 = vpop.xlane.xlu0 %564  ;;  %v2358_v17 = vsub.f32 %v2293_v21, %v598_v13  ;;  %643 = vadd.xlane.f32.xlu1 %v622_v60  ;;  %653 = vadd.xlane.f32.xlu0 %v627_v8 }
 0x24a   : > { %v567_v15 = vpop.xlane.xlu1 %566  ;;  %v591_v1 = vmul.f32 0.0078125, %v565_v16  ;;  %v629_v10 = vmul.f32 %v2361_v14, %v2361_v14 }
 0x24b   : > { %v592_v18 = vmul.f32 0.0078125, %v567_v15  ;;  %v630_v19 = vmul.f32 %v2358_v17, %v2358_v17 }
 0x24c   : > { %v2373_v25 = vsub.f32 %v2297_v24, %v591_v1 }
 0x24d   : > { %v581_v22 = vpop.xlane.xlu0 %580  ;;  %v2368_v23 = vsub.f32 %v2299_v27, %v592_v18  ;;  %659 = vadd.xlane.f32.xlu1 %v630_v19  ;;  %641 = vadd.xlane.f32.xlu0 %v621_v20 }
 0x24e   : > { %v583_v21 = vpop.xlane.xlu1 %582  ;;  %v599_v28 = vmul.f32 0.0078125, %v581_v22  ;;  %v623_v24 = vmul.f32 %v2373_v25, %v2373_v25 }
 0x24f   : > { %v600_v26 = vmul.f32 0.0078125, %v583_v21  ;;  %v624_v32 = vmul.f32 %v2368_v23, %v2368_v23 }
 0x250   : > { %v2381_v27 = vsub.f32 %v2303_v30, %v599_v28 }
 0x251   : > { %v2378_v33 = vsub.f32 %v2305_v31, %v600_v26  ;;  %647 = vadd.xlane.f32.xlu1 %v624_v32  ;;  %657 = vadd.xlane.f32.xlu0 %v629_v10 }
 0x252   : > { %v631_v35 = vmul.f32 %v2381_v27, %v2381_v27 }
 0x253   : > { %v632_v34 = vmul.f32 %v2378_v33, %v2378_v33 }
 0x255   : > { %663 = vadd.xlane.f32.xlu1 %v632_v34  ;;  %645 = vadd.xlane.f32.xlu0 %v623_v24 }
 0x259   : > { %661 = vadd.xlane.f32.xlu0 %v631_v35 }
 0x2c5   : > { %v636_v38 = vpop.xlane.xlu1 %635 }
 0x2c6   : > { %v666_v31 = vmul.f32 0.0078125, %v636_v38 }
 0x2c8   : > { %v682_v40 = vadd.f32 1e-12, %v666_v31 }
 0x2c9   : > { %v652_v46 = vpop.xlane.xlu1 %651  ;;  %v634_v47 = vpop.xlane.xlu0 %633 }
 0x2ca   : > { %1554 = vrsqrt.f32 %v682_v40  ;;  %v674_v30 = vmul.f32 0.0078125, %v652_v46  ;;  %v665_v48 = vmul.f32 0.0078125, %v634_v47 }
 0x2cc   : > { %v690_v50 = vadd.f32 1e-12, %v674_v30  ;;  %v681_v29 = vadd.f32 1e-12, %v665_v48 }
 0x2cd   : > { %v640_v53 = vpop.xlane.xlu1 %639  ;;  %v650_v36 = vpop.xlane.xlu0 %649 }
 0x2ce   : > { %1556 = vrsqrt.f32 %v690_v50  ;;  %v668_v54 = vmul.f32 0.0078125, %v640_v53  ;;  %v673_v55 = vmul.f32 0.0078125, %v650_v36 }
 0x2cf   : > { %1558 = vrsqrt.f32 %v681_v29 }
 0x2d0   : > { %v684_v42 = vadd.f32 1e-12, %v668_v54  ;;  %v689_v59 = vadd.f32 1e-12, %v673_v55 }
 0x2d1   : > { %v656_v52 = vpop.xlane.xlu1 %655 }
 0x2d2   : > { %1560 = vrsqrt.f32 %v684_v42  ;;  %v676_v62 = vmul.f32 0.0078125, %v656_v52  ;;  %v638_v2 = vpop.xlane.xlu0 %637 }
 0x2d3   : > { %1562 = vrsqrt.f32 %v689_v59  ;;  %v667_v63 = vmul.f32 0.0078125, %v638_v2 }
 0x2d4   : > { %v1555_v61 = vpop.eup %1554  ;;  %v692_v4 = vadd.f32 1e-12, %v676_v62 }
 0x2d5   : > { %v714_v7 = vmul.f32 %v1555_v61, %v2310_v37  ;;  %v683_v5 = vadd.f32 1e-12, %v667_v63 }
 0x2d6   : > { %1564 = vrsqrt.f32 %v692_v4  ;;  %v644_v11 = vpop.xlane.xlu1 %643  ;;  %v654_v13 = vpop.xlane.xlu0 %653 }
 0x2d7   : > { %v734_v41 = vmul.f32 %v2392_v0, %v714_v7  ;;  %1566 = vrsqrt.f32 %v683_v5  ;;  %v670_v8 = vmul.f32 0.0078125, %v644_v11  ;;  %v675_v16 = vmul.f32 0.0078125, %v654_v13 }
 0x2d8   : > { %v1557_v60 = vpop.eup %1556 }
 0x2d9   : > { %v1559_v15 = vpop.eup %1558  ;;  %v754_v18 = vadd.f32 %v2395_v6, %v734_v41  ;;  %v722_v1 = vmul.f32 %v1557_v60, %v2313_v39  ;;  %v686_v19 = vadd.f32 1e-12, %v670_v8  ;;  %v691_v20 = vadd.f32 1e-12, %v675_v16 }
 0x2da   : > { %v713_v43 = vmul.f32 %v1559_v15, %v2318_v49  ;;  %v660_v22 = vpop.xlane.xlu1 %659  ;;  %v642_v21 = vpop.xlane.xlu0 %641 }
 0x2db   : > { %770 = vst [vmem:[#allocation2 + $0x8] sm:$0xff] %v754_v18  ;;  %v742_v37 = vmul.f32 %v2392_v0, %v722_v1  ;;  %1568 = vrsqrt.f32 %v686_v19  ;;  %v678_v28 = vmul.f32 0.0078125, %v660_v22  ;;  %v669_v32 = vmul.f32 0.0078125, %v642_v21 }
 0x2dc   : > { %v1561_v10 = vpop.eup %1560  ;;  %v733_v26 = vmul.f32 %v2392_v0, %v713_v43  ;;  %1570 = vrsqrt.f32 %v691_v20 }
 0x2dd   : > { %v1563_v34 = vpop.eup %1562  ;;  %v762_v24 = vadd.f32 %v2395_v6, %v742_v37  ;;  %v716_v39 = vmul.f32 %v1561_v10, %v2321_v51  ;;  %v694_v38 = vadd.f32 1e-12, %v678_v28  ;;  %v685_v31 = vadd.f32 1e-12, %v669_v32 }
 0x2de   : > { %v753_v49 = vadd.f32 %v2395_v6, %v733_v26  ;;  %v721_v35 = vmul.f32 %v1563_v34, %v2328_v57  ;;  %v648_v46 = vpop.xlane.xlu1 %647  ;;  %v658_v47 = vpop.xlane.xlu0 %657 }
 0x2df   : > { %778 = vst [vmem:[#allocation2 + $0x48] sm:$0xff] %v762_v24  ;;  %v736_v40 = vmul.f32 %v2392_v0, %v716_v39  ;;  %1572 = vrsqrt.f32 %v694_v38  ;;  %v672_v50 = vmul.f32 0.0078125, %v648_v46  ;;  %v677_v29 = vmul.f32 0.0078125, %v658_v47 }
 0x2e0   : > { %v1565_v30 = vpop.eup %1564  ;;  %769 = vst [vmem:[#allocation2] sm:$0xff] %v753_v49  ;;  %v741_v48 = vmul.f32 %v2392_v0, %v721_v35  ;;  %1574 = vrsqrt.f32 %v685_v31 }
 0x2e1   : > { %v756_v51 = vadd.f32 %v2395_v6, %v736_v40  ;;  %v724_v53 = vmul.f32 %v1565_v30, %v2331_v58  ;;  %v1567_v57 = vpop.eup %1566  ;;  %v688_v54 = vadd.f32 1e-12, %v672_v50  ;;  %v693_v55 = vadd.f32 1e-12, %v677_v29 }
 0x2e2   : > { %v761_v36 = vadd.f32 %v2395_v6, %v741_v48  ;;  %v715_v42 = vmul.f32 %v1567_v57, %v2338_v56  ;;  %v664_v59 = vpop.xlane.xlu1 %663  ;;  %v646_v44 = vpop.xlane.xlu0 %645 }
 0x2e3   : > { %772 = vst [vmem:[#allocation2 + $0x18] sm:$0xff] %v756_v51  ;;  %v744_v45 = vmul.f32 %v2392_v0, %v724_v53  ;;  %1576 = vrsqrt.f32 %v688_v54  ;;  %v680_v52 = vmul.f32 0.0078125, %v664_v59  ;;  %v671_v62 = vmul.f32 0.0078125, %v646_v44 }
 0x2e4   : > { %777 = vst [vmem:[#allocation2 + $0x40] sm:$0xff] %v761_v36  ;;  %v735_v58 = vmul.f32 %v2392_v0, %v715_v42  ;;  %1578 = vrsqrt.f32 %v693_v55 }
 0x2e5   : > { %v764_v2 = vadd.f32 %v2395_v6, %v744_v45  ;;  %v1569_v61 = vpop.eup %1568  ;;  %v696_v4 = vadd.f32 1e-12, %v680_v52  ;;  %v687_v63 = vadd.f32 1e-12, %v671_v62 }
 0x2e6   : > { %v1571_v7 = vpop.eup %1570  ;;  %v755_v5 = vadd.f32 %v2395_v6, %v735_v58  ;;  %v718_v56 = vmul.f32 %v1569_v61, %v2348_v9  ;;  %v662_v41 = vpop.xlane.xlu0 %661 }
 0x2e7   : > { %780 = vst [vmem:[#allocation2 + $0x58] sm:$0xff] %v764_v2  ;;  %v723_v11 = vmul.f32 %v1571_v7, %v2343_v3  ;;  %1580 = vrsqrt.f32 %v696_v4  ;;  %v679_v13 = vmul.f32 0.0078125, %v662_v41 }
 0x2e8   : > { %771 = vst [vmem:[#allocation2 + $0x10] sm:$0xff] %v755_v5  ;;  %v738_v60 = vmul.f32 %v2392_v0, %v718_v56  ;;  %1582 = vrsqrt.f32 %v687_v63 }
 0x2e9   : > { %v1573_v8 = vpop.eup %1572  ;;  %v743_v16 = vmul.f32 %v2392_v0, %v723_v11  ;;  %v695_v15 = vadd.f32 1e-12, %v679_v13 }
 0x2ea   : > { %v1575_v18 = vpop.eup %1574  ;;  %v758_v1 = vadd.f32 %v2395_v6, %v738_v60  ;;  %v726_v43 = vmul.f32 %v1573_v8, %v2358_v17 }
 0x2eb   : > { %v763_v9 = vadd.f32 %v2395_v6, %v743_v16  ;;  %v717_v19 = vmul.f32 %v1575_v18, %v2351_v12  ;;  %1584 = vrsqrt.f32 %v695_v15 }
 0x2ec   : > { %774 = vst [vmem:[#allocation2 + $0x28] sm:$0xff] %v758_v1  ;;  %v746_v3 = vmul.f32 %v2392_v0, %v726_v43 }
 0x2ed   : > { %v1577_v20 = vpop.eup %1576  ;;  %779 = vst [vmem:[#allocation2 + $0x50] sm:$0xff] %v763_v9  ;;  %v737_v37 = vmul.f32 %v2392_v0, %v717_v19 }
 0x2ee   : > { %v1579_v22 = vpop.eup %1578  ;;  %v766_v21 = vadd.f32 %v2395_v6, %v746_v3  ;;  %v720_v10 = vmul.f32 %v1577_v20, %v2368_v23 }
 0x2ef   : > { %v757_v26 = vadd.f32 %v2395_v6, %v737_v37  ;;  %v725_v17 = vmul.f32 %v1579_v22, %v2361_v14 }
 0x2f0   : > { %782 = vst [vmem:[#allocation2 + $0x68] sm:$0xff] %v766_v21  ;;  %v740_v12 = vmul.f32 %v2392_v0, %v720_v10 }
 0x2f1   : > { %v1581_v28 = vpop.eup %1580  ;;  %773 = vst [vmem:[#allocation2 + $0x20] sm:$0xff] %v757_v26  ;;  %v745_v32 = vmul.f32 %v2392_v0, %v725_v17 }
 0x2f2   : > { %v1583_v34 = vpop.eup %1582  ;;  %v760_v24 = vadd.f32 %v2395_v6, %v740_v12  ;;  %v728_v39 = vmul.f32 %v1581_v28, %v2378_v33 }
 0x2f3   : > { %v765_v49 = vadd.f32 %v2395_v6, %v745_v32  ;;  %v719_v23 = vmul.f32 %v1583_v34, %v2373_v25 }
 0x2f4   : > { %776 = vst [vmem:[#allocation2 + $0x38] sm:$0xff] %v760_v24  ;;  %v748_v35 = vmul.f32 %v2392_v0, %v728_v39 }
 0x2f5   : > { %v1585_v14 = vpop.eup %1584  ;;  %781 = vst [vmem:[#allocation2 + $0x60] sm:$0xff] %v765_v49  ;;  %v739_v38 = vmul.f32 %v2392_v0, %v719_v23 }
 0x2f6   : > { %v768_v31 = vadd.f32 %v2395_v6, %v748_v35  ;;  %v727_v40 = vmul.f32 %v1585_v14, %v2381_v27 }
 0x2f7   : > { %v759_v46 = vadd.f32 %v2395_v6, %v739_v38 }
 0x2f8   : > { %784 = vst [vmem:[#allocation2 + $0x78] sm:$0xff] %v768_v31  ;;  %v747_v33 = vmul.f32 %v2392_v0, %v727_v40 }
 0x2f9   : > { %775 = vst [vmem:[#allocation2 + $0x30] sm:$0xff] %v759_v46 }
 0x2fa   : > { %v767_v47 = vadd.f32 %v2395_v6, %v747_v33 }
 0x2fc   : > { %783 = vst [vmem:[#allocation2 + $0x70] sm:$0xff] %v767_v47 }
 0x2fd PF: > { %v802_v25 = vld [vmem:[%s2166_s8 + $0x8] sm:$0xff]  ;;  %v804_v27 = vld [vmem:[%s2166_s8 + $0x18] sm:$0xff]  ;;  %v801_v30 = vld [vmem:[%s2166_s8] sm:$0xff]  ;;  %v1838_v6 = vmov 0.0   ;;  %s2672_s6 = sld [smem:[#allocation16_spill]]  ;;  %s2673_s27 = sld [smem:[#allocation17_spill]] }
 0x2fe   : > { %v1307_v48 = vpack.c.bf16 %v804_v27, %v802_v25  ;;  %v803_v0 = vld [vmem:[%s2166_s8 + $0x10] sm:$0xff]  ;;  %v806_v50 = vld [vmem:[%s2166_s8 + $0x28] sm:$0xff]  ;;  %v808_v29 = vld [vmem:[%s2166_s8 + $0x38] sm:$0xff]  ;;  %897 = vmatprep.mubr.f32.mxu0 %v1838_v6  ;;  %945 = vmatprep.mubr.f32.mxu1 %v1838_v6  ;;  %s1043_s25 = sshll.u32 %s2175_s4, 4  ;;  %s2674_s11 = sld [smem:[#allocation27_spill]]  ;;  %s2529_s25 = int_to_ptr.vmem [resolvable:$true] %s1043_s25 }
 0x2ff   : > { %v1309_v51 = vpack.c.bf16 %v803_v0, %v801_v30  ;;  %v1311_v53 = vpack.c.bf16 %v808_v29, %v806_v50  ;;  %v805_v57 = vld [vmem:[%s2166_s8 + $0x20] sm:$0xff]  ;;  %v807_v36 = vld [vmem:[%s2166_s8 + $0x30] sm:$0xff]  ;;  %v810_v54 = vld [vmem:[%s2166_s8 + $0x48] sm:$0xff]  ;;  %s2537_s0 = scalar_lea.sflag [#allocation5], %s279_s5  ;;  %s1674_s12 = scalar_lea.vmem %s2529_s25, 4096 }
 0x300   : > { %1308 = vmatprep.subr.bf16.mxu0 %v1307_v48  ;;  %1355 = vmatprep.subr.bf16.mxu1 %v1307_v48  ;;  %v812_v55 = vld [vmem:[%s2166_s8 + $0x58] sm:$0xff]  ;;  %v1313_v45 = vpack.c.bf16 %v807_v36, %v805_v57  ;;  %v809_v59 = vld [vmem:[%s2166_s8 + $0x40] sm:$0xff]  ;;  %v811_v44 = vld [vmem:[%s2166_s8 + $0x50] sm:$0xff]  ;;  %p1675_p3 = scmp.ne.s32.totalorder %s2529_s25, %s1674_s12  ;;  %p2675_p11 = scmp.ne.s32.totalorder %s2656_s18, 0 }
 0x301   : > { %1310 = vmatpush1.bf16.msra.mxu0 %v1309_v51  ;;  %1363 = vmatpush1.bf16.msra.mxu1 %v1309_v51  ;;  %v1315_v42 = vpack.c.bf16 %v812_v55, %v810_v54  ;;  %v814_v52 = vld [vmem:[%s2166_s8 + $0x68] sm:$0xff]  ;;  %v816_v62 = vld [vmem:[%s2166_s8 + $0x78] sm:$0xff]  ;;  %v1317_v2 = vpack.c.bf16 %v811_v44, %v809_v59  ;;  %v813_v61 = vld [vmem:[%s2166_s8 + $0x60] sm:$0xff] }
 0x302   : > { %1312 = vmatprep.subr.bf16.mxu0 %v1311_v53  ;;  %1356 = vmatprep.subr.bf16.mxu1 %v1311_v53  ;;  %v1319_v58 = vpack.c.bf16 %v816_v62, %v814_v52  ;;  %v815_v4 = vld [vmem:[%s2166_s8 + $0x70] sm:$0xff]  ;;  %v818_v63 = vld [vmem:[%s2166_s8 + $0x88] sm:$0xff]  ;;  %v820_v7 = vld [vmem:[%s2166_s8 + $0x98] sm:$0xff]  ;;  %p1676_p9 = pnand %p1675_p3, %p2675_p11 }
 0x303   : > { %v1321_v5 = vpack.c.bf16 %v815_v4, %v813_v61  ;;  %v1323_v56 = vpack.c.bf16 %v820_v7, %v818_v63  ;;  %v817_v41 = vld [vmem:[%s2166_s8 + $0x80] sm:$0xff]  ;;  %v819_v11 = vld [vmem:[%s2166_s8 + $0x90] sm:$0xff]  ;;  %v822_v13 = vld [vmem:[%s2166_s8 + $0xa8] sm:$0xff]  ;;  %s1179_s20 = sshll.u32 %s2672_s6, 1  ;;  %s1186_s23 = sshll.u32 %s2673_s27, 7 }
 0x304   : > { %v824_v60 = vld [vmem:[%s2166_s8 + $0xb8] sm:$0xff]  ;;  %v1325_v8 = vpack.c.bf16 %v819_v11, %v817_v41  ;;  %v821_v15 = vld [vmem:[%s2166_s8 + $0xa0] sm:$0xff]  ;;  %v823_v18 = vld [vmem:[%s2166_s8 + $0xb0] sm:$0xff]  ;;  %s1040_s26 = sadd.s32 %s1186_s23, %s1179_s20  ;;  %p1677_p12 = pneg %p1676_p9 }
 0x305   : > { %1314 = vmatpush1.bf16.msra.mxu0 %v1313_v45  ;;  %1364 = vmatpush1.bf16.msra.mxu1 %v1313_v45  ;;  %v1327_v16 = vpack.c.bf16 %v824_v60, %v822_v13  ;;  %v826_v1 = vld [vmem:[%s2166_s8 + $0xc8] sm:$0xff]  ;;  %v828_v43 = vld [vmem:[%s2166_s8 + $0xd8] sm:$0xff]  ;;  %v1329_v9 = vpack.c.bf16 %v823_v18, %v821_v15  ;;  %v825_v3 = vld [vmem:[%s2166_s8 + $0xc0] sm:$0xff]  ;;  %s1181_s13 = sshll.u32 %s1040_s26, 7 }
 0x306   : > { %1316 = vmatprep.subr.bf16.mxu0 %v1315_v42  ;;  %1357 = vmatprep.subr.bf16.mxu1 %v1315_v42  ;;  %v1331_v19 = vpack.c.bf16 %v828_v43, %v826_v1  ;;  %v827_v20 = vld [vmem:[%s2166_s8 + $0xd0] sm:$0xff]  ;;  %v830_v37 = vld [vmem:[%s2166_s8 + $0xe8] sm:$0xff]  ;;  %v832_v22 = vld [vmem:[%s2166_s8 + $0xf8] sm:$0xff]  ;;  %s2527_s9 = scalar_lea.hbm %s2674_s11, %s1181_s13 }
 0x307   : > { %v1333_v21 = vpack.c.bf16 %v827_v20, %v825_v3  ;;  %v1335_v10 = vpack.c.bf16 %v832_v22, %v830_v37  ;;  %v829_v26 = vld [vmem:[%s2166_s8 + $0xe0] sm:$0xff]  ;;  %v831_v17 = vld [vmem:[%s2166_s8 + $0xf0] sm:$0xff]  ;;  %v786_v34 = vld [vmem:[#allocation2 + $0x8] sm:$0xff]  ;;  %s1839_s8 = smov [#allocation9]  }
 0x308   : > { %v1337_v12 = vpack.c.bf16 %v831_v17, %v829_v26  ;;  %v785_v28 = vld [vmem:[#allocation2] sm:$0xff]  ;;  %v794_v24 = vld [vmem:[#allocation2 + $0x48] sm:$0xff]  ;;  %v787_v39 = vld [vmem:[#allocation2 + $0x10] sm:$0xff]  ;;  %s1678_s10 = sshll.u32 %s1839_s8, 4  ;;  %s1679_s10 = int_to_ptr.vmem [resolvable:$false] %s1678_s10 }
 0x309   : > { %1318 = vmatpush1.bf16.msra.mxu0 %v1317_v2  ;;  %1365 = vmatpush1.bf16.msra.mxu1 %v1317_v2  ;;  %v793_v32 = vld [vmem:[#allocation2 + $0x40] sm:$0xff]  ;;  %v795_v49 = vld [vmem:[#allocation2 + $0x50] sm:$0xff]  ;;  %v788_v23 = vld [vmem:[#allocation2 + $0x18] sm:$0xff]  ;;  %s1680_s29 = scalar_lea.vmem %s1679_s10, 8192  ;;  %p1681_p6 = scmp.lt.s32.totalorder %s2529_s25, %s1679_s10 }
 0x30a   : > { %1320 = vmatprep.subr.bf16.mxu0 %v1319_v58  ;;  %1358 = vmatprep.subr.bf16.mxu1 %v1319_v58  ;;  %v796_v35 = vld [vmem:[#allocation2 + $0x58] sm:$0xff]  ;;  %v789_v14 = vld [vmem:[#allocation2 + $0x20] sm:$0xff]  ;;  %v790_v31 = vld [vmem:[#allocation2 + $0x28] sm:$0xff]  ;;  %p1682_p5 = scmp.lt.s32.totalorder %s1680_s29, %s1674_s12 }
 0x30b   : > { %v797_v38 = vld [vmem:[#allocation2 + $0x60] sm:$0xff]  ;;  %v798_v40 = vld [vmem:[#allocation2 + $0x68] sm:$0xff]  ;;  %v791_v46 = vld [vmem:[#allocation2 + $0x30] sm:$0xff] }
 0x30c   : > { %v799_v33 = vld [vmem:[#allocation2 + $0x70] sm:$0xff]  ;;  %v792_v47 = vld [vmem:[#allocation2 + $0x38] sm:$0xff]  ;;  %p1683_p4 = por %p1682_p5, %p1681_p6 }
 0x30d   : > { %1322 = vmatpush1.bf16.msra.mxu0 %v1321_v5  ;;  %1366 = vmatpush1.bf16.msra.mxu1 %v1321_v5  ;;  %v800_v25 = vld [vmem:[#allocation2 + $0x78] sm:$0xff] }
 0x30e   : > { %1324 = vmatprep.subr.bf16.mxu0 %v1323_v56  ;;  %1359 = vmatprep.subr.bf16.mxu1 %v1323_v56  ;;  %p1684_p10 = pnand %p1683_p4, %p1677_p12 }
 0x311   : > { %1326 = vmatpush1.bf16.msra.mxu0 %v1325_v8  ;;  %1367 = vmatpush1.bf16.msra.mxu1 %v1325_v8 }
 0x312   : > { %1328 = vmatprep.subr.bf16.mxu0 %v1327_v16  ;;  %1360 = vmatprep.subr.bf16.mxu1 %v1327_v16 }
 0x315   : > { %1330 = vmatpush1.bf16.msra.mxu0 %v1329_v9  ;;  %1368 = vmatpush1.bf16.msra.mxu1 %v1329_v9 }
 0x316   : > { %1332 = vmatprep.subr.bf16.mxu0 %v1331_v19  ;;  %1361 = vmatprep.subr.bf16.mxu1 %v1331_v19 }
 0x319   : > { %1334 = vmatpush1.bf16.msra.mxu0 %v1333_v21  ;;  %1369 = vmatpush1.bf16.msra.mxu1 %v1333_v21 }
 0x31a   : > { %1336 = vmatprep.subr.bf16.mxu0 %v1335_v10  ;;  %1362 = vmatprep.subr.bf16.mxu1 %v1335_v10 }
 0x31d   : > { %1338 = vmatpush1.bf16.msra.mxu0 %v1337_v12  ;;  %1370 = vmatpush1.bf16.msra.mxu1 %v1337_v12 }
 0x320   : > { %898 = vmatmul.mubr.f32.vlgmr.msra.gmra.mrb[0].mxu0 %v785_v28  ;;  %946 = vmatmul.mubr.f32.vlgmr.msra.gmra.mrb[0].mxu1 %v793_v32 }
 0x321   : > { %903 = vmatprep.mubr.f32.mxu0 %v1838_v6  ;;  %951 = vmatprep.mubr.f32.mxu1 %v1838_v6 }
 0x324   : > { %904 = vmatmul.mubr.f32.gmra.mrb[2].mxu0 %v786_v34  ;;  %952 = vmatmul.mubr.f32.gmra.mrb[2].mxu1 %v794_v24 }
 0x325   : > { %909 = vmatprep.mubr.f32.mxu0 %v1838_v6  ;;  %957 = vmatprep.mubr.f32.mxu1 %v1838_v6 }
 0x328   : > { %910 = vmatmul.mubr.f32.gmra.mrb[4].mxu0 %v787_v39  ;;  %958 = vmatmul.mubr.f32.gmra.mrb[4].mxu1 %v795_v49 }
 0x329   : > { %915 = vmatprep.mubr.f32.mxu0 %v1838_v6  ;;  %963 = vmatprep.mubr.f32.mxu1 %v1838_v6 }
 0x32c   : > { %916 = vmatmul.mubr.f32.gmra.mrb[6].mxu0 %v788_v23  ;;  %964 = vmatmul.mubr.f32.gmra.mrb[6].mxu1 %v796_v35 }
 0x32d   : > { %921 = vmatprep.mubr.f32.mxu0 %v1838_v6  ;;  %969 = vmatprep.mubr.f32.mxu1 %v1838_v6 }
 0x330   : > { %922 = vmatmul.mubr.f32.gmra.mrb[8].mxu0 %v789_v14  ;;  %970 = vmatmul.mubr.f32.gmra.mrb[8].mxu1 %v797_v38 }
 0x331   : > { %927 = vmatprep.mubr.f32.mxu0 %v1838_v6  ;;  %975 = vmatprep.mubr.f32.mxu1 %v1838_v6 }
 0x334   : > { %928 = vmatmul.mubr.f32.gmra.mrb[10].mxu0 %v790_v31  ;;  %976 = vmatmul.mubr.f32.gmra.mrb[10].mxu1 %v798_v40 }
 0x335   : > { %933 = vmatprep.mubr.f32.mxu0 %v1838_v6  ;;  %981 = vmatprep.mubr.f32.mxu1 %v1838_v6 }
 0x338   : > { %934 = vmatmul.mubr.f32.gmra.mrb[12].mxu0 %v791_v46  ;;  %982 = vmatmul.mubr.f32.gmra.mrb[12].mxu1 %v799_v33 }
 0x339   : > { %939 = vmatprep.mubr.f32.mxu0 %v1838_v6  ;;  %987 = vmatprep.mubr.f32.mxu1 %v1838_v6 }
 0x33c   : > { %940 = vmatmul.mubr.f32.gmra.mrb[14].mxu0 %v792_v47  ;;  %988 = vmatmul.mubr.f32.gmra.mrb[14].mxu1 %v800_v25 }
 0x3f3   : > { %v899_v27 = vpop.f32.mrb[0].mxu0  ;;  %v947_v30 = vpop.f32.mrb[0].mxu1 }
 0x3f4   : > { %994 = vst [vmem:[%s2175_s4] sm:$0xff] %v899_v27  ;;  %1010 = vst [vmem:[%s2175_s4 + $0x80] sm:$0xff] %v947_v30  ;;  %v901_v48 = vpop.f32.mrb[1].mxu0  ;;  %v949_v0 = vpop.f32.mrb[1].mxu1 }
 0x3f5   : > { %995 = vst [vmem:[%s2175_s4 + $0x8] sm:$0xff] %v901_v48  ;;  %1011 = vst [vmem:[%s2175_s4 + $0x88] sm:$0xff] %v949_v0 }
 0x3f7   : > { %v905_v50 = vpop.f32.mrb[2].mxu0  ;;  %v953_v29 = vpop.f32.mrb[2].mxu1 }
 0x3f8   : > { %996 = vst [vmem:[%s2175_s4 + $0x10] sm:$0xff] %v905_v50  ;;  %1012 = vst [vmem:[%s2175_s4 + $0x90] sm:$0xff] %v953_v29  ;;  %v907_v6 = vpop.f32.mrb[3].mxu0  ;;  %v955_v51 = vpop.f32.mrb[3].mxu1 }
 0x3f9   : > { %997 = vst [vmem:[%s2175_s4 + $0x18] sm:$0xff] %v907_v6  ;;  %1013 = vst [vmem:[%s2175_s4 + $0x98] sm:$0xff] %v955_v51 }
 0x3fb   : > { %v911_v53 = vpop.f32.mrb[4].mxu0  ;;  %v959_v57 = vpop.f32.mrb[4].mxu1 }
 0x3fc   : > { %998 = vst [vmem:[%s2175_s4 + $0x20] sm:$0xff] %v911_v53  ;;  %1014 = vst [vmem:[%s2175_s4 + $0xa0] sm:$0xff] %v959_v57  ;;  %v913_v36 = vpop.f32.mrb[5].mxu0  ;;  %v961_v54 = vpop.f32.mrb[5].mxu1 }
 0x3fd   : > { %999 = vst [vmem:[%s2175_s4 + $0x28] sm:$0xff] %v913_v36  ;;  %1015 = vst [vmem:[%s2175_s4 + $0xa8] sm:$0xff] %v961_v54 }
 0x3ff   : > { %v917_v55 = vpop.f32.mrb[6].mxu0  ;;  %v965_v45 = vpop.f32.mrb[6].mxu1 }
 0x400   : > { %1000 = vst [vmem:[%s2175_s4 + $0x30] sm:$0xff] %v917_v55  ;;  %1016 = vst [vmem:[%s2175_s4 + $0xb0] sm:$0xff] %v965_v45  ;;  %v919_v42 = vpop.f32.mrb[7].mxu0  ;;  %v967_v59 = vpop.f32.mrb[7].mxu1 }
 0x401   : > { %1001 = vst [vmem:[%s2175_s4 + $0x38] sm:$0xff] %v919_v42  ;;  %1017 = vst [vmem:[%s2175_s4 + $0xb8] sm:$0xff] %v967_v59 }
 0x403   : > { %v923_v44 = vpop.f32.mrb[8].mxu0  ;;  %v971_v52 = vpop.f32.mrb[8].mxu1 }
 0x404   : > { %1002 = vst [vmem:[%s2175_s4 + $0x40] sm:$0xff] %v923_v44  ;;  %1018 = vst [vmem:[%s2175_s4 + $0xc0] sm:$0xff] %v971_v52  ;;  %v925_v62 = vpop.f32.mrb[9].mxu0  ;;  %v973_v2 = vpop.f32.mrb[9].mxu1 }
 0x405   : > { %1003 = vst [vmem:[%s2175_s4 + $0x48] sm:$0xff] %v925_v62  ;;  %1019 = vst [vmem:[%s2175_s4 + $0xc8] sm:$0xff] %v973_v2 }
 0x407   : > { %v929_v58 = vpop.f32.mrb[10].mxu0  ;;  %v977_v61 = vpop.f32.mrb[10].mxu1 }
 0x408   : > { %1004 = vst [vmem:[%s2175_s4 + $0x50] sm:$0xff] %v929_v58  ;;  %1020 = vst [vmem:[%s2175_s4 + $0xd0] sm:$0xff] %v977_v61  ;;  %v931_v4 = vpop.f32.mrb[11].mxu0  ;;  %v979_v63 = vpop.f32.mrb[11].mxu1 }
 0x409   : > { %1005 = vst [vmem:[%s2175_s4 + $0x58] sm:$0xff] %v931_v4  ;;  %1021 = vst [vmem:[%s2175_s4 + $0xd8] sm:$0xff] %v979_v63 }
 0x40b   : > { %v935_v7 = vpop.f32.mrb[12].mxu0  ;;  %v983_v5 = vpop.f32.mrb[12].mxu1 }
 0x40c   : > { %1006 = vst [vmem:[%s2175_s4 + $0x60] sm:$0xff] %v935_v7  ;;  %1022 = vst [vmem:[%s2175_s4 + $0xe0] sm:$0xff] %v983_v5  ;;  %v937_v56 = vpop.f32.mrb[13].mxu0  ;;  %v985_v41 = vpop.f32.mrb[13].mxu1 }
 0x40d   : > { %1007 = vst [vmem:[%s2175_s4 + $0x68] sm:$0xff] %v937_v56  ;;  %1023 = vst [vmem:[%s2175_s4 + $0xe8] sm:$0xff] %v985_v41 }
 0x40f   : > { %v941_v11 = vpop.f32.mrb[14].mxu0  ;;  %v989_v13 = vpop.f32.mrb[14].mxu1 }
 0x410   : > { %1008 = vst [vmem:[%s2175_s4 + $0x70] sm:$0xff] %v941_v11  ;;  %1024 = vst [vmem:[%s2175_s4 + $0xf0] sm:$0xff] %v989_v13  ;;  %v943_v60 = vpop.f32.mrb[15].mxu0  ;;  %v991_v8 = vpop.f32.mrb[15].mxu1 }
 0x411   : > { %1009 = vst [vmem:[%s2175_s4 + $0x78] sm:$0xff] %v943_v60  ;;  %1025 = vst [vmem:[%s2175_s4 + $0xf8] sm:$0xff] %v991_v8 }
 0x412   : > { %1687 = shalt.err (!%p1684_p10)
}
 0x413   : > { %s1688_s5 = scalar_lea.hbm %s2527_s9, 4096  ;;  %s1692_s30 = scalar_lea.hbm %s2674_s11, 32768 }
 0x414   : > { %p1689_p8 = scmp.ne.s32.totalorder %s2527_s9, %s1688_s5  ;;  %p1693_p13 = scmp.lt.u32.totalorder %s2527_s9, %s2674_s11 }
 0x415   : > { %p1694_p7 = scmp.lt.u32.totalorder %s1692_s30, %s1688_s5  ;;  %p1696_p3 = scmp.lt.u32.totalorder %s1688_s5, %s2527_s9 }
 0x416   : > { %p1690_p2 = pnand %p1689_p8, %p2675_p11 }
 0x417   : > { %p1695_p1 = por %p1694_p7, %p1693_p13 }
 0x418   : > { %p1691_p0 = pneg %p1690_p2 }
 0x419   : > { %p1697_p9 = por %p1696_p3, %p1695_p1 }
 0x41b   : > { %p1698_p12 = pnand %p1697_p9, %p1691_p0 }
 0x41d   : > { %1701 = shalt.err (!%p1698_p12)
}
 0x41e   : > { %s1840_s27 = smov 256   ;;  %s1841_s20 = smov 1024  }
 0x41f   : > { %s1842_s23 = smov 16  }
 0x420   : > { %1379 = dma.vmem_to_hbm [thread:$0]  (%p2675_p11), %s2529_s25, 4096, %s2527_s9, %s2537_s0, %s1840_s27, %s1841_s20, %s1842_s23  }
 0x421 PF: > { %p1399_p6 = scmp.ge.s32.totalorder %s1828_s28, 2  ;;  %s1058_s26 = sand.u32 1, %s1776_s15  }
 0x422   : > { %p2676_p5 = scmp.ne.s32.totalorder %s2657_s7, 0  ;;  %s1059_s13 = scalar_lea.sflag [#allocation5], %s1058_s26 }
 0x424   : > { %p1393_p4 = pnand %p1399_p6, %p2676_p5 }
 0x426   : > { %1771 = dma.done.wait (!%p1393_p4), %s1059_s13, 4096  }
 0x427   : > { %1773 = vsyncadd (!%p1393_p4), %s1059_s13, 4294963200  ;;  %s21_s28 = sadd.s32 1, %s1828_s28   ;;  %s2678_s18 = sld [smem:[#allocation23_spill]] }
 0x428   : > { %p2566_p10 = scmp.ge.s32.totalorder %s21_s28, 10   ;;  %s2679_s25 = sld [smem:[#allocation14_spill]] }
 0x429   : > { %s2680_s20 = sld [smem:[#allocation24_spill]]  ;;  %s2681_s24 = sld [smem:[#allocation15_spill]] }
 0x42a   : > { %s2682_s23 = sld [smem:[#allocation22_spill]]  ;;  %s2683_s7 = sld [smem:[#allocation18_spill]] }
 0x42b   : > { %s2684_s9 = sld [smem:[#allocation19_spill]]  ;;  %s2685_s26 = sld [smem:[#allocation20_spill]] }
 0x42c   : > { %s2686_s27 = sld [smem:[#allocation21_spill]]  ;;  %s2687_s15 = smov %s1780_s16 }
 0x42d   : > { %s2688_s16 = smov %s1784_s17  ;;  %s2689_s17 = smov %s2678_s18 }
 0x42e   : > { %s2690_s18 = smov %s1792_s19  ;;  %s2691_s19 = smov %s2679_s25 }
 0x42f   : > { %s2692_s21 = smov %s1804_s22  ;;  %s2693_s22 = smov %s2681_s24 }
 0x430   : > { %s2694_s24 = smov %s2683_s7  ;;  %20 = sbr.rel (!%p2566_p10) target bundleno = 15 (0xf), region = 100 }
 0x431   : > { %s2695_s25 = smov %s2684_s9 }
 0x437   :  { %1064 = vsyncpa [#allocation4], 1 }
 0x438   :  { %1066 = vsyncpa [#allocation4 + $0x1], 1 }
 0x439   :  { %1067 = vsyncpa [#allocation7], 1 }
 0x43a   :  { %1068 = vsyncpa [#allocation5], 1 }
 0x43b   :  { %1070 = vsyncpa [#allocation5 + $0x1], 1 }

// kernel: tpu_custom_call.1
= control target key start
LH: loop header
LB: loop body
LE: loop exit
PB: predicated region body
PF: predicated region fallthrough
CT: control target
= control target key end

     0   :  { %s2613_s0 = inlined_call_operand.hbm [shape: f32[256,128], index: 0, kind: input, shape index: {}]   ;;  %s2614_s1 = inlined_call_operand.hbm [shape: f32[128,128], index: 1, kind: input, shape index: {}]   ;;  %s2615_s2 = inlined_call_operand.vmem [shape: f32[3,128], index: 2, kind: input, shape index: {}]   ;;  %s2616_s3 = inlined_call_operand.hbm [shape: f32[128,1024], index: 3, kind: input, shape index: {}]   ;;  %s2617_s4 = inlined_call_operand.hbm [shape: f32[256,1024], index: 4, kind: output, shape index: {}]  }
   0x1   :  { %2635 = sst [smem:[#allocation25_spill]] %s2613_s0 }
   0x2   :  { %2636 = sst [smem:[#allocation26_spill]] %s2615_s2 }
   0x3   :  { %2637 = sst [smem:[#allocation27_spill]] %s2617_s4 }
   0x4   :  { %9 = vsyncpa [#allocation4], 0 }
   0x5   :  { %11 = vsyncpa [#allocation4 + $0x1], 0 }
   0x6   :  { %12 = vsyncpa [#allocation7], 0 }
   0x7   :  { %13 = vsyncpa [#allocation5], 0 }
   0x8   :  { %15 = vsyncpa [#allocation5 + $0x1], 0  ;;  %s1868_s15 = smov 0   ;;  %s1870_s16 = smov 0  }
   0x9   :  { %s1872_s17 = smov 0   ;;  %s1874_s18 = smov 0  }
   0xa   :  { %s1876_s19 = smov 0   ;;  %s1878_s20 = smov 0  }
   0xb   :  { %s1880_s21 = smov 0   ;;  %s1882_s22 = smov 0  }
   0xc   :  { %s1884_s23 = smov 0   ;;  %s1886_s24 = smov 0  }
   0xd   :  { %s1888_s25 = smov 0   ;;  %s1890_s26 = smov 0  }
   0xe   :  { %s1892_s27 = smov 0   ;;  %s1894_s28 = smov 0  }
   0xf LB: > { %2638 = sst [smem:[#allocation14_spill]] %s1796_s20  ;;  %s30_s29 = sadd.s32 1, %s1820_s26  ;;  %s1828_s28 = sphi %s1894_s28, %s21_s28   ;;  %s1824_s27 = sphi %s1892_s27, %s2686_s27   ;;  %s1820_s26 = sphi %s1890_s26, %s2685_s26   ;;  %s1816_s25 = sphi %s1888_s25, %s2695_s25   ;;  %s1812_s24 = sphi %s1886_s24, %s2694_s24   ;;  %s1808_s23 = sphi %s1884_s23, %s2682_s23   ;;  %s1804_s22 = sphi %s1882_s22, %s2693_s22   ;;  %s1800_s21 = sphi %s1880_s21, %s2692_s21   ;;  %s1796_s20 = sphi %s1878_s20, %s2680_s20   ;;  %s1792_s19 = sphi %s1876_s19, %s2691_s19   ;;  %s1788_s18 = sphi %s1874_s18, %s2690_s18   ;;  %s1784_s17 = sphi %s1872_s17, %s2689_s17   ;;  %s1780_s16 = sphi %s1870_s16, %s2688_s16   ;;  %s1776_s15 = sphi %s1868_s15, %s2687_s15  }
  0x10   : > { %2639 = sst [smem:[#allocation15_spill]] %s1808_s23  ;;  %s33_s30 = sadd.s32 1, %s1824_s27 }
  0x11   : > { %2640 = sst [smem:[#allocation16_spill]] %s1812_s24  ;;  %p31_p0 = scmp.ge.s32.totalorder %s30_s29, 4 }
  0x12   : > { %2641 = sst [smem:[#allocation17_spill]] %s1816_s25  ;;  %s40_s5 = sadd.s32 1, %s1808_s23 }
  0x13   : > { %2642 = sst [smem:[#allocation18_spill]] %s1820_s26  ;;  %p47_p1 = scmp.ne.s32.totalorder %s1808_s23, %s1804_s22 }
  0x14   : > { %2643 = sst [smem:[#allocation19_spill]] %s1824_s27  ;;  %p2622_p2 = scmp.eq.s32.totalorder %s1828_s28, 0 }
  0x15   : > { %s2697_s29 = smov (%p31_p0, %s30_s29), 0  ;;  %s2699_s30 = smov (!%p31_p0, %s33_s30), %s1824_s27 }
  0x16   : > { %2644 = sst [smem:[#allocation20_spill]] %s2697_s29  ;;  %p1949_p3 = por %p2622_p2, %p47_p1 }
  0x17   : > { %s1955_s7 = ssub.s32 %s1820_s26, %s2697_s29  ;;  %p35_p4 = scmp.ge.s32.totalorder %s2699_s30, 2 }
  0x18   : > { %p106_p5 = scmp.eq.s32.totalorder %s1955_s7, 0  ;;  %s136_s8 = sadd.s32 1, %s1784_s17 }
  0x19   : > { %s2701_s30 = smov (%p35_p4, %s2699_s30), 0  ;;  %p2621_p6 = scmp.lt.s32.totalorder %s1828_s28, 8 }
  0x1a   : > { %2646 = sst [smem:[#allocation21_spill]] %s2701_s30  ;;  %s37_s9 = ssub.s32 %s1824_s27, %s2701_s30 }
  0x1b   : > { %p38_p7 = scmp.eq.s32.totalorder %s37_s9, 0  ;;  %s133_s10 = sor.u32 %s1955_s7, %s37_s9 }
  0x1c   : > { %p134_p8 = scmp.eq.s32.totalorder %s133_s10, 0  ;;  %s189_s11 = sand.u32 1, %s1828_s28  }
  0x1d   : > { %s1967_s12 = scalar_select %p38_p7, %s1808_s23, %s40_s5  }
  0x1e   : > { %s1970_s13 = scalar_select %p134_p8, %s1784_s17, %s136_s8  }
  0x1f   : > { %2647 = sst [smem:[#allocation22_spill]] %s1967_s12  ;;  %s191_s14 = sand.u32 1, %s1808_s23  }
  0x20   : > { %2648 = sst [smem:[#allocation23_spill]] %s1970_s13  ;;  %s1165_s29 = sshll.u32 %s191_s14, 7 }
  0x21   : > { %s1184_s4 = sshll.u32 %s1824_s27, 11  ;;  %s2649_s0 = sld [smem:[#allocation25_spill]] }
  0x22   : > { %s193_s30 = scalar_lea.vmem [#allocation3], %s1165_s29  ;;  %p1983_p9 = pnand %p2621_p6, %p1949_p3 }
  0x23   : > { %s200_s9 = sshll.u32 %s193_s30, 4  ;;  %s1989_s8 = scalar_lea.sflag [#allocation4], %s189_s11  ;;  %s1987_s9 = int_to_ptr.vmem [resolvable:$true] %s200_s9 }
  0x24   : > { %p1588_p11 = pneg %p1983_p9 }
  0x27   : > { %s1977_s24 = scalar_lea.hbm %s2649_s0, %s1184_s4  ;;  %s1591_s29 = scalar_lea.hbm %s2649_s0, 4096 }
  0x28   : > { %s1586_s2 = scalar_lea.hbm %s1977_s24, 2048  ;;  %p1592_p0 = scmp.lt.u32.totalorder %s1977_s24, %s2649_s0 }
  0x29   : > { %p1587_p10 = scmp.ne.s32.totalorder %s1977_s24, %s1586_s2  ;;  %p1593_p1 = scmp.lt.u32.totalorder %s1591_s29, %s1586_s2 }
  0x2a   : > { %p1595_p4 = scmp.lt.u32.totalorder %s1586_s2, %s1977_s24 }
  0x2b   : > { %p1589_p12 = pnand %p1588_p11, %p1587_p10  ;;  %p1594_p3 = por %p1593_p1, %p1592_p0 }
  0x2d   : > { %p1590_p13 = pneg %p1589_p12  ;;  %p1596_p7 = por %p1595_p4, %p1594_p3 }
  0x2f   : > { %p1597_p8 = pnand %p1596_p7, %p1590_p13 }
  0x31   : > { %1600 = shalt.err (!%p1597_p8)
}
  0x32   : > { %s1601_s10 = scalar_lea.vmem %s1987_s9, 2048  ;;  %s1830_s11 = smov [#allocation3]  }
  0x33   : > { %p1602_p10 = scmp.ne.s32.totalorder %s1987_s9, %s1601_s10  ;;  %s1606_s14 = sshll.u32 %s1830_s11, 4  ;;  %s1607_s14 = int_to_ptr.vmem [resolvable:$false] %s1606_s14 }
  0x34   : > { %s1608_s4 = scalar_lea.vmem %s1607_s14, 4096  ;;  %p1609_p2 = scmp.lt.s32.totalorder %s1987_s9, %s1607_s14 }
  0x35   : > { %p1604_p12 = pnand %p1602_p10, %p1588_p11  ;;  %p1610_p0 = scmp.lt.s32.totalorder %s1608_s4, %s1601_s10 }
  0x37   : > { %p1605_p6 = pneg %p1604_p12  ;;  %p1611_p1 = por %p1610_p0, %p1609_p2 }
  0x39   : > { %p1612_p3 = pnand %p1611_p1, %p1605_p6 }
  0x3b   : > { %1615 = shalt.err (!%p1612_p3)
}
  0x3c   : > { %s2623_s2 = smov 128   ;;  %s2624_s25 = smov 8  }
  0x3d   : > { %1388 = dma.hbm_to_vmem [thread:$0]  (!%p1983_p9), %s1977_s24, 2048, %s1987_s9, %s1989_s8, %s2623_s2, %s2623_s2, %s2624_s25  }
  0x3e   : > { %s2021_s29 = sadd.s32 4294967295, %s1828_s28   ;;  %s1161_s30 = sadd.s32 4294967294, %s1828_s28  }
  0x3f   : > { %p53_p2 = scmp.ne.s32.totalorder %s1804_s22, %s1800_s21  ;;  %p2629_p6 = scmp.eq.s32.totalorder %s2021_s29, 0 }
  0x40   : > { %s108_s6 = sadd.s32 1, %s1796_s20  ;;  %p115_p11 = scmp.ne.s32.totalorder %s1796_s20, %s1792_s19 }
  0x41   : > { %p2032_p13 = por %p2629_p6, %p53_p2  ;;  %p121_p4 = scmp.ne.s32.totalorder %s1792_s19, %s1788_s18 }
  0x42   : > { %s2041_s24 = scalar_select %p106_p5, %s1796_s20, %s108_s6  }
  0x43   : > { %s2651_s5 = scalar_select %p2032_p13, 1, 0 }
  0x44   : > { %2652 = sst [smem:[#allocation24_spill]] %s2041_s24  ;;  %p2653_p9 = scmp.eq.s32.totalorder %s1828_s28, 0 }
  0x45   : > { %p2051_p8 = por %p121_p4, %p2629_p6  ;;  %p146_p10 = scmp.ne.s32.totalorder %s1784_s17, %s1780_s16 }
  0x46   : > { %p2045_p7 = por %p115_p11, %p2653_p9  ;;  %p147_p12 = scmp.eq.s32.totalorder %s2021_s29, 7 }
  0x47   : > { %s2655_s21 = scalar_select %p2051_p8, 1, 0 }
  0x48   : > { %p152_p0 = scmp.ne.s32.totalorder %s1780_s16, %s1776_s15  ;;  %p153_p1 = scmp.eq.s32.totalorder %s1161_s30, 7 }
  0x49   : > { %p2060_p5 = por %p147_p12, %p146_p10  ;;  %p1162_p3 = scmp.ge.s32.totalorder %s1828_s28, 1 }
  0x4a   : > { %p2065_p2 = por %p153_p1, %p152_p0  ;;  %p160_p11 = scmp.lt.s32.totalorder %s1828_s28, 9 }
  0x4b   : > { %s2656_s18 = scalar_select %p2060_p5, 1, 0 }
  0x4c   : > { %s2657_s7 = scalar_select %p2065_p2, 1, 0 }
  0x4d   : > { %p2070_p4 = pnand %p1162_p3, %p160_p11  ;;  %s1833_s11 = smov [#allocation6]  }
  0x4e   : > { %s172_s14 = sshll.u32 %s1833_s11, 4  ;;  %p2659_p9 = scmp.lt.s32.totalorder %s1828_s28, 8  ;;  %s2074_s14 = int_to_ptr.vmem [resolvable:$true] %s172_s14 }
  0x4f   : > { %s2658_s10 = scalar_select %p2070_p4, 1, 0 }
  0x50   : > { %p2080_p10 = pnand %p2659_p9, %p2045_p7  ;;  %p1381_p12 = pneg %p2070_p4 }
  0x51   : > { %s212_s30 = sand.u32 1, %s1796_s20   ;;  %s1185_s25 = sshll.u32 %s1820_s26, 8 }
  0x52   : > { %s2660_s4 = scalar_select %p2080_p10, 1, 0 }
  0x53   : > { %s1168_s6 = sshll.u32 %s212_s30, 8  ;;  %p2089_p0 = pnand %p1381_p12, %p2629_p6 }
  0x54   : > { %s214_s11 = scalar_lea.vmem [#allocation8], %s1168_s6  ;;  %s2097_s12 = scalar_lea.hbm %s2616_s3, %s1185_s25 }
  0x55   : > { %s221_s0 = sshll.u32 %s214_s11, 4  ;;  %s1616_s13 = scalar_lea.hbm %s2614_s1, 2048  ;;  %s2123_s0 = int_to_ptr.vmem [resolvable:$true] %s221_s0 }
  0x56   : > { %p1617_p7 = scmp.ne.s32.totalorder %s2614_s1, %s1616_s13  ;;  %p1618_p1 = pneg %p2089_p0 }
  0x57   : > { %p1623_p9 = scmp.lt.u32.totalorder %s1616_s13, %s2614_s1 }
  0x58   : > { %p1619_p3 = pnand %p1618_p1, %p1617_p7 }
  0x5a   : > { %p1620_p11 = pneg %p1619_p3 }
  0x5c   : > { %p1625_p12 = pnand %p1623_p9, %p1620_p11 }
  0x5e   : > { %1628 = shalt.err (!%p1625_p12)
}
  0x5f   : > { %s1629_s27 = scalar_lea.vmem %s2074_s14, 2048  ;;  %p1637_p8 = scmp.lt.s32.totalorder %s2074_s14, %s2074_s14 }
  0x60   : > { %p1630_p6 = scmp.ne.s32.totalorder %s2074_s14, %s1629_s27  ;;  %p1638_p13 = scmp.lt.s32.totalorder %s1629_s27, %s1629_s27 }
  0x62   : > { %p1632_p2 = pnand %p1630_p6, %p1618_p1  ;;  %p1639_p4 = por %p1638_p13, %p1637_p8 }
  0x64   : > { %p1633_p5 = pneg %p1632_p2 }
  0x66   : > { %p1640_p10 = pnand %p1639_p4, %p1633_p5 }
  0x68   : > { %1643 = shalt.err (!%p1640_p10)
}
  0x69   : > { %s2662_s20 = smov 8   ;;  %s2663_s23 = smov 128  }
  0x6a   : > { %1384 = dma.hbm_to_vmem [thread:$0]  (!%p2089_p0), %s2614_s1, 2048, %s2074_s14, [#allocation7], %s2663_s23, %s2663_s23, %s2662_s20  }
  0x6b   : > { %s1644_s25 = scalar_lea.hbm %s2097_s12, 4096  ;;  %p2664_p13 = scmp.ne.s32.totalorder %s2660_s4, 0 }
  0x6c   : > { %p1645_p6 = scmp.ne.s32.totalorder %s2097_s12, %s1644_s25  ;;  %s1649_s11 = scalar_lea.hbm %s2616_s3, 16384 }
  0x6d   : > { %p1646_p8 = pneg %p2664_p13  ;;  %p1650_p4 = scmp.lt.u32.totalorder %s2097_s12, %s2616_s3 }
  0x6e   : > { %p1651_p10 = scmp.lt.u32.totalorder %s1649_s11, %s1644_s25  ;;  %p1653_p7 = scmp.lt.u32.totalorder %s1644_s25, %s2097_s12 }
  0x6f   : > { %p1647_p5 = pnand %p1646_p8, %p1645_p6 }
  0x70   : > { %p1652_p0 = por %p1651_p10, %p1650_p4 }
  0x71   : > { %p1648_p2 = pneg %p1647_p5 }
  0x72   : > { %p1654_p1 = por %p1653_p7, %p1652_p0 }
  0x74   : > { %p1655_p3 = pnand %p1654_p1, %p1648_p2 }
  0x76   : > { %1658 = shalt.err (!%p1655_p3)
}
  0x77   : > { %s1659_s14 = scalar_lea.vmem %s2123_s0, 4096  ;;  %s1834_s6 = smov [#allocation8]  }
  0x78   : > { %p1660_p11 = scmp.ne.s32.totalorder %s2123_s0, %s1659_s14  ;;  %s1664_s27 = sshll.u32 %s1834_s6, 4  ;;  %s1665_s27 = int_to_ptr.vmem [resolvable:$false] %s1664_s27 }
  0x79   : > { %s1666_s20 = scalar_lea.vmem %s1665_s27, 8192  ;;  %p1667_p6 = scmp.lt.s32.totalorder %s2123_s0, %s1665_s27 }
  0x7a   : > { %p1662_p9 = pnand %p1660_p11, %p1646_p8  ;;  %p1668_p5 = scmp.lt.s32.totalorder %s1666_s20, %s1659_s14 }
  0x7c   : > { %p1663_p12 = pneg %p1662_p9  ;;  %p1669_p4 = por %p1668_p5, %p1667_p6 }
  0x7e   : > { %p1670_p10 = pnand %p1669_p4, %p1663_p12 }
  0x80   : > { %1673 = shalt.err (!%p1670_p10)
}
  0x81   : > { %s1835_s23 = smov 1024   ;;  %s1836_s26 = smov 256  }
  0x82   : > { %s1837_s13 = smov 16   ;;  %p2665_p8 = scmp.ne.s32.totalorder %s2658_s10, 0 }
  0x83   : > { %1391 = dma.hbm_to_vmem [thread:$0]  (!%p2664_p13), %s2097_s12, 4096, %s2123_s0, %s1989_s8, %s1835_s23, %s1836_s26, %s1837_s13  }
  0x84   : > { %233 = sbr.rel (%p2665_p8) target bundleno = 1057 (0x421), region = 36  ;;  %s235_s25 = sand.u32 (!%p2665_p8), 1, %s2021_s29  }
  0x85   : > { %s237_s2 = sand.u32 (!%p2665_p8), 1, %s1804_s22   ;;  %s236_s11 = scalar_lea.sflag (!%p2665_p8), [#allocation4], %s235_s25 }
  0x86   : > { %s1172_s24 = sshll.u32 (!%p2665_p8), %s237_s2, 7  ;;  %p2666_p2 = scmp.ne.s32.totalorder (!%p2665_p8), %s2651_s5, 0 }
  0x87   : > { %s2155_s9 = scalar_lea.vmem (!%p2665_p8), [#allocation3], %s1172_s24 }
  0x8b   : > { %1759 = dma.done.wait (%p2666_p2), %s236_s11, 2048  }
  0x8c   : > { %1761 = vsyncadd (%p2666_p2), %s236_s11, 4294965248  ;;  %p2667_p0 = scmp.eq.s32.totalorder %s2021_s29, 0 }
  0x8e   : > { %1763 = dma.done.wait (%p2667_p0), [#allocation7], 2048   ;;  %p2668_p13 = pmov %p2667_p0 }
  0x8f   : > { %s250_s0 = sand.u32 1, %s1792_s19   ;;  %p2669_p7 = scmp.ne.s32.totalorder %s2655_s21, 0 }
  0x90   : > { %1765 = vsyncadd (%p2668_p13), [#allocation7], 4294965248  ;;  %s1174_s12 = sshll.u32 %s250_s0, 8 }
  0x91   : > { %s2166_s8 = scalar_lea.vmem [#allocation8], %s1174_s12 }
  0x92   : > { %1767 = dma.done.wait (%p2669_p7), %s236_s11, 4096  }
  0x93   : > { %1769 = vsyncadd (%p2669_p7), %s236_s11, 4294963200  ;;  %s279_s5 = sand.u32 1, %s1780_s16   ;;  %s2670_s29 = sld [smem:[#allocation16_spill]] }
  0x94   : > { %s1175_s10 = sshll.u32 %s279_s5, 8 }
  0x95   : > { %s2175_s4 = scalar_lea.vmem [#allocation9], %s1175_s10 }
  0x99   : > { %p1176_p1 = scmp.ne.s32.totalorder %s2670_s29, 0 }
  0x9a   : > { %v306_v0 = vld [vmem:[#allocation6] sm:$0xff] (!%p1176_p1)  ;;  %v307_v1 = vld [vmem:[#allocation6 + $0x8] sm:$0xff] (!%p1176_p1)  ;;  %v308_v2 = vld [vmem:[#allocation6 + $0x10] sm:$0xff] (!%p1176_p1)  ;;  %v323_v40 = vlaneseq (!%p1176_p1)  ;;  %s2671_s14 = sld [smem:[#allocation26_spill]] (!%p1176_p1) }
  0x9b   : > { %289 = sbr.rel (%p1176_p1) target bundleno = 765 (0x2fd), region = 52  ;;  %v1275_v3 = vpack.c.bf16 (!%p1176_p1), %v307_v1, %v306_v0  ;;  %v309_v4 = vld [vmem:[#allocation6 + $0x18] sm:$0xff] (!%p1176_p1)  ;;  %v310_v6 = vld [vmem:[#allocation6 + $0x20] sm:$0xff] (!%p1176_p1)  ;;  %v311_v7 = vld [vmem:[#allocation6 + $0x28] sm:$0xff] (!%p1176_p1) }
  0x9c   : > { %v1279_v5 = vpack.c.bf16 (!%p1176_p1), %v309_v4, %v308_v2  ;;  %v1283_v8 = vpack.c.bf16 (!%p1176_p1), %v311_v7, %v310_v6  ;;  %v290_v9 = vld [vmem:[%s2155_s9] sm:$0xff] (!%p1176_p1)  ;;  %v312_v11 = vld [vmem:[#allocation6 + $0x30] sm:$0xff] (!%p1176_p1)  ;;  %v313_v12 = vld [vmem:[#allocation6 + $0x38] sm:$0xff] (!%p1176_p1)  ;;  %v2194_v41 = vshrl.u32 (!%p1176_p1), %v323_v40, 7 }
  0x9d   : > { %1276 = vmatprep.subr.bf16.mxu0 (!%p1176_p1), %v1275_v3  ;;  %1339 = vmatprep.subr.bf16.mxu1 (!%p1176_p1), %v1275_v3  ;;  %v298_v10 = vld [vmem:[%s2155_s9 + $0x40] sm:$0xff] (!%p1176_p1)  ;;  %v1287_v13 = vpack.c.bf16 (!%p1176_p1), %v313_v12, %v312_v11  ;;  %v315_v15 = vld [vmem:[#allocation6 + $0x48] sm:$0xff] (!%p1176_p1)  ;;  %v316_v17 = vld [vmem:[#allocation6 + $0x50] sm:$0xff] (!%p1176_p1) }
  0x9e   : > { %1278 = vmatpush3.bf16.msra.mxu0 (!%p1176_p1), %v1275_v3  ;;  %1347 = vmatpush3.bf16.msra.mxu1 (!%p1176_p1), %v1275_v3  ;;  %v314_v14 = vld [vmem:[#allocation6 + $0x40] sm:$0xff] (!%p1176_p1)  ;;  %v317_v18 = vld [vmem:[#allocation6 + $0x58] sm:$0xff] (!%p1176_p1)  ;;  %v319_v21 = vld [vmem:[#allocation6 + $0x68] sm:$0xff] (!%p1176_p1)  ;;  %v325_v42 = vsub.s32 (!%p1176_p1), 0, %v2194_v41 }
  0x9f   : > { %1280 = vmatprep.subr.bf16.mxu0 (!%p1176_p1), %v1279_v5  ;;  %1340 = vmatprep.subr.bf16.mxu1 (!%p1176_p1), %v1279_v5  ;;  %v1291_v16 = vpack.c.bf16 (!%p1176_p1), %v315_v15, %v314_v14  ;;  %v1295_v19 = vpack.c.bf16 (!%p1176_p1), %v317_v18, %v316_v17  ;;  %v318_v20 = vld [vmem:[#allocation6 + $0x60] sm:$0xff] (!%p1176_p1)  ;;  %v320_v23 = vld [vmem:[#allocation6 + $0x70] sm:$0xff] (!%p1176_p1)  ;;  %v321_v24 = vld [vmem:[#allocation6 + $0x78] sm:$0xff] (!%p1176_p1) }
  0xa0   : > { %1251 = vmatprep.mubr.f32.mxu0 (!%p1176_p1), %v290_v9  ;;  %1263 = vmatprep.mubr.f32.mxu1 (!%p1176_p1), %v298_v10  ;;  %v1299_v22 = vpack.c.bf16 (!%p1176_p1), %v319_v21, %v318_v20  ;;  %v1303_v25 = vpack.c.bf16 (!%p1176_p1), %v321_v24, %v320_v23  ;;  %v291_v26 = vld [vmem:[%s2155_s9 + $0x8] sm:$0xff] (!%p1176_p1)  ;;  %v292_v28 = vld [vmem:[%s2155_s9 + $0x10] sm:$0xff] (!%p1176_p1)  ;;  %v293_v30 = vld [vmem:[%s2155_s9 + $0x18] sm:$0xff] (!%p1176_p1) }
  0xa1   : > { %v299_v27 = vld [vmem:[%s2155_s9 + $0x48] sm:$0xff] (!%p1176_p1)  ;;  %v300_v29 = vld [vmem:[%s2155_s9 + $0x50] sm:$0xff] (!%p1176_p1)  ;;  %v301_v31 = vld [vmem:[%s2155_s9 + $0x58] sm:$0xff] (!%p1176_p1) }
  0xa2   : > { %1282 = vmatpush3.bf16.msra.mxu0 %v1279_v5  ;;  %1348 = vmatpush3.bf16.msra.mxu1 %v1279_v5  ;;  %v294_v32 = vld [vmem:[%s2155_s9 + $0x20] sm:$0xff]  ;;  %v295_v34 = vld [vmem:[%s2155_s9 + $0x28] sm:$0xff]  ;;  %v296_v36 = vld [vmem:[%s2155_s9 + $0x30] sm:$0xff] }
  0xa3   : > { %1284 = vmatprep.subr.bf16.mxu0 %v1283_v8  ;;  %1341 = vmatprep.subr.bf16.mxu1 %v1283_v8  ;;  %v302_v33 = vld [vmem:[%s2155_s9 + $0x60] sm:$0xff]  ;;  %v303_v35 = vld [vmem:[%s2155_s9 + $0x68] sm:$0xff]  ;;  %v304_v37 = vld [vmem:[%s2155_s9 + $0x70] sm:$0xff] }
  0xa4   : > { %v297_v38 = vld [vmem:[%s2155_s9 + $0x38] sm:$0xff]  ;;  %v2200_v43 = vld [vmem:[%s2671_s14] sm:$0x7] }
  0xa5   : > { %v305_v39 = vld [vmem:[%s2155_s9 + $0x78] sm:$0xff]  ;;  %v2203_v44 = vrot.slane %v2200_v43, %v325_v42 }
  0xa6   : > { %1286 = vmatpush3.bf16.msra.mxu0 %v1283_v8  ;;  %1349 = vmatpush3.bf16.msra.mxu1 %v1283_v8 }
  0xa7   : > { %1288 = vmatprep.subr.bf16.mxu0 %v1287_v13  ;;  %1342 = vmatprep.subr.bf16.mxu1 %v1287_v13 }
  0xaa   : > { %1290 = vmatpush3.bf16.msra.mxu0 %v1287_v13  ;;  %1350 = vmatpush3.bf16.msra.mxu1 %v1287_v13 }
  0xab   : > { %1292 = vmatprep.subr.bf16.mxu0 %v1291_v16  ;;  %1343 = vmatprep.subr.bf16.mxu1 %v1291_v16 }
  0xae   : > { %1294 = vmatpush3.bf16.msra.mxu0 %v1291_v16  ;;  %1351 = vmatpush3.bf16.msra.mxu1 %v1291_v16 }
  0xaf   : > { %1296 = vmatprep.subr.bf16.mxu0 %v1295_v19  ;;  %1344 = vmatprep.subr.bf16.mxu1 %v1295_v19 }
  0xb2   : > { %1298 = vmatpush3.bf16.msra.mxu0 %v1295_v19  ;;  %1352 = vmatpush3.bf16.msra.mxu1 %v1295_v19 }
  0xb3   : > { %1300 = vmatprep.subr.bf16.mxu0 %v1299_v22  ;;  %1345 = vmatprep.subr.bf16.mxu1 %v1299_v22 }
  0xb6   : > { %1302 = vmatpush3.bf16.msra.mxu0 %v1299_v22  ;;  %1353 = vmatpush3.bf16.msra.mxu1 %v1299_v22 }
  0xb7   : > { %1304 = vmatprep.subr.bf16.mxu0 %v1303_v25  ;;  %1346 = vmatprep.subr.bf16.mxu1 %v1303_v25 }
  0xba   : > { %1306 = vmatpush3.bf16.msra.mxu0 %v1303_v25  ;;  %1354 = vmatpush3.bf16.msra.mxu1 %v1303_v25 }
  0xbd   : > { %1252 = vmatmul.mubr.f32.vlgmr.msra.gmra.mrb[0].mxu0 %v291_v26  ;;  %1264 = vmatmul.mubr.f32.vlgmr.msra.gmra.mrb[0].mxu1 %v299_v27 }
  0xbe   : > { %1254 = vmatprep.mubr.f32.mxu0 %v292_v28  ;;  %1266 = vmatprep.mubr.f32.mxu1 %v300_v29 }
  0xc1   : > { %1255 = vmatmul.mubr.f32.gmra.mrb[2].mxu0 %v293_v30  ;;  %1267 = vmatmul.mubr.f32.gmra.mrb[2].mxu1 %v301_v31 }
  0xc2   : > { %1257 = vmatprep.mubr.f32.mxu0 %v294_v32  ;;  %1269 = vmatprep.mubr.f32.mxu1 %v302_v33 }
  0xc5   : > { %1258 = vmatmul.mubr.f32.gmra.mrb[4].mxu0 %v295_v34  ;;  %1270 = vmatmul.mubr.f32.gmra.mrb[4].mxu1 %v303_v35 }
  0xc6   : > { %1260 = vmatprep.mubr.f32.mxu0 %v296_v36  ;;  %1272 = vmatprep.mubr.f32.mxu1 %v304_v37 }
  0xc9   : > { %1261 = vmatmul.mubr.f32.gmra.mrb[6].mxu0 %v297_v38  ;;  %1273 = vmatmul.mubr.f32.gmra.mrb[6].mxu1 %v305_v39 }
 0x190   : > { %v1253_v45 = vpop.f32.mrb[0].mxu0  ;;  %v1265_v46 = vpop.f32.mrb[0].mxu1 }
 0x191   : > { %v399_v47 = vadd.f32 %v1253_v45, %v2203_v44  ;;  %v439_v48 = vadd.f32 %v1265_v46, %v2203_v44  ;;  %v393_v49 = vpop.f32.mrb[1].mxu0  ;;  %v433_v50 = vpop.f32.mrb[1].mxu1 }
 0x192   : > { %v394_v51 = vadd.f32 %v393_v49, %v2203_v44  ;;  %v2209_v52 = vadd.f32 %v433_v50, %v2203_v44 }
 0x193   : > { %v489_v53 = vmul.f32 0.70710677, %v399_v47  ;;  %v497_v54 = vmul.f32 0.70710677, %v439_v48  ;;  %v473_v23 = vmul.f32 0.5, %v399_v47  ;;  %v481_v27 = vmul.f32 0.5, %v439_v48 }
 0x194   : > { %v488_v55 = vmul.f32 0.70710677, %v394_v51  ;;  %v496_v56 = vmul.f32 0.70710677, %v2209_v52  ;;  %v1256_v57 = vpop.f32.mrb[2].mxu0  ;;  %v1268_v58 = vpop.f32.mrb[2].mxu1 }
 0x195   : > { %1522 = verf.f32 %v489_v53  ;;  %v409_v59 = vadd.f32 %v1256_v57, %v2203_v44  ;;  %v2214_v60 = vadd.f32 %v1268_v58, %v2203_v44  ;;  %v403_v61 = vpop.f32.mrb[3].mxu0  ;;  %v443_v62 = vpop.f32.mrb[3].mxu1  ;;  %v472_v34 = vmul.f32 0.5, %v394_v51 }
 0x196   : > { %1524 = verf.f32 %v497_v54  ;;  %v2217_v63 = vadd.f32 %v443_v62, %v2203_v44  ;;  %v2220_v1 = vadd.f32 %v403_v61, %v2203_v44  ;;  %v480_v50 = vmul.f32 0.5, %v2209_v52 }
 0x197   : > { %1526 = verf.f32 %v488_v55  ;;  %v491_v0 = vmul.f32 0.70710677, %v409_v59  ;;  %v499_v4 = vmul.f32 0.70710677, %v2214_v60  ;;  %v475_v35 = vmul.f32 0.5, %v409_v59 }
 0x198   : > { %v1259_v2 = vpop.f32.mrb[4].mxu0  ;;  %v1271_v3 = vpop.f32.mrb[4].mxu1  ;;  %1528 = verf.f32 %v496_v56  ;;  %v498_v5 = vmul.f32 0.70710677, %v2217_v63  ;;  %v490_v9 = vmul.f32 0.70710677, %v2220_v1 }
 0x199   : > { %1530 = verf.f32 %v491_v0  ;;  %v413_v6 = vpop.f32.mrb[5].mxu0  ;;  %v453_v7 = vpop.f32.mrb[5].mxu1  ;;  %v2229_v10 = vadd.f32 %v1259_v2, %v2203_v44  ;;  %v2237_v20 = vadd.f32 %v1271_v3, %v2203_v44  ;;  %v483_v55 = vmul.f32 0.5, %v2214_v60 }
 0x19a   : > { %v2225_v8 = vadd.f32 %v413_v6, %v2203_v44  ;;  %1532 = verf.f32 %v499_v4  ;;  %v2233_v15 = vadd.f32 %v453_v7, %v2203_v44  ;;  %v474_v0 = vmul.f32 0.5, %v2220_v1 }
 0x19b   : > { %1534 = verf.f32 %v498_v5  ;;  %v493_v19 = vmul.f32 0.70710677, %v2229_v10  ;;  %v501_v32 = vmul.f32 0.70710677, %v2237_v20  ;;  %v477_v7 = vmul.f32 0.5, %v2229_v10 }
 0x19c   : > { %v1262_v11 = vpop.f32.mrb[6].mxu0  ;;  %v1274_v12 = vpop.f32.mrb[6].mxu1  ;;  %v492_v14 = vmul.f32 0.70710677, %v2225_v8  ;;  %1536 = verf.f32 %v490_v9  ;;  %v500_v24 = vmul.f32 0.70710677, %v2233_v15 }
 0x19d   : > { %v423_v13 = vpop.f32.mrb[7].mxu0  ;;  %v463_v16 = vpop.f32.mrb[7].mxu1  ;;  %v2247_v33 = vadd.f32 %v1262_v11, %v2203_v44  ;;  %v469_v49 = vadd.f32 %v1274_v12, %v2203_v44  ;;  %v476_v4 = vmul.f32 0.5, %v2225_v8  ;;  %v484_v9 = vmul.f32 0.5, %v2233_v15 }
 0x19e   : > { %1538 = verf.f32 %v492_v14  ;;  %v2241_v25 = vadd.f32 %v423_v13, %v2203_v44  ;;  %v464_v40 = vadd.f32 %v463_v16, %v2203_v44  ;;  %v482_v44 = vmul.f32 0.5, %v2217_v63 }
 0x19f   : > { %v1523_v17 = vpop.eup %1522  ;;  %1540 = verf.f32 %v493_v19  ;;  %v495_v48 = vmul.f32 0.70710677, %v2247_v33  ;;  %v503_v59 = vmul.f32 0.70710677, %v469_v49  ;;  %v485_v13 = vmul.f32 0.5, %v2237_v20 }
 0x1a0   : > { %v1525_v18 = vpop.eup %1524  ;;  %v521_v21 = vadd.f32 1.0, %v1523_v17  ;;  %1542 = verf.f32 %v500_v24  ;;  %v494_v39 = vmul.f32 0.70710677, %v2241_v25  ;;  %v502_v54 = vmul.f32 0.70710677, %v464_v40 }
 0x1a1   : > { %v1527_v22 = vpop.eup %1526  ;;  %v529_v28 = vadd.f32 1.0, %v1525_v18  ;;  %1544 = verf.f32 %v501_v32  ;;  %v478_v17 = vmul.f32 0.5, %v2241_v25  ;;  %v479_v19 = vmul.f32 0.5, %v2247_v33 }
 0x1a2   : > { %v1529_v26 = vpop.eup %1528  ;;  %v2243_v29 = vmul.f32 %v521_v21, %v473_v23  ;;  %v520_v30 = vadd.f32 1.0, %v1527_v22  ;;  %1546 = verf.f32 %v494_v39  ;;  %v486_v23 = vmul.f32 0.5, %v464_v40 }
 0x1a3   : > { %v1531_v31 = vpop.eup %1530  ;;  %v2249_v36 = vmul.f32 %v529_v28, %v481_v27  ;;  %v528_v46 = vadd.f32 1.0, %v1529_v26  ;;  %1548 = verf.f32 %v495_v48  ;;  %v487_v26 = vmul.f32 0.5, %v469_v49 }
 0x1a4   : > { %554 = vadd.xlane.f32.xlu0 %v2243_v29  ;;  %v523_v37 = vadd.f32 1.0, %v1531_v31  ;;  %v1533_v38 = vpop.eup %1532  ;;  %v2257_v45 = vmul.f32 %v520_v30, %v472_v34  ;;  %1550 = verf.f32 %v502_v54 }
 0x1a5   : > { %570 = vadd.xlane.f32.xlu1 %v2249_v36  ;;  %v1535_v47 = vpop.eup %1534  ;;  %v531_v51 = vadd.f32 1.0, %v1533_v38  ;;  %v2265_v56 = vmul.f32 %v528_v46, %v480_v50  ;;  %1552 = verf.f32 %v503_v59 }
 0x1a6   : > { %v2255_v42 = vmul.f32 %v523_v37, %v475_v35  ;;  %v1537_v53 = vpop.eup %1536  ;;  %v530_v57 = vadd.f32 1.0, %v1535_v47 }
 0x1a7   : > { %v2268_v61 = vmul.f32 %v531_v51, %v483_v55  ;;  %v522_v52 = vadd.f32 1.0, %v1537_v53 }
 0x1a8   : > { %552 = vadd.xlane.f32.xlu0 %v2257_v45  ;;  %v1539_v58 = vpop.eup %1538  ;;  %v2273_v60 = vmul.f32 %v530_v57, %v482_v44 }
 0x1a9   : > { %558 = vadd.xlane.f32.xlu1 %v2255_v42  ;;  %v1541_v62 = vpop.eup %1540  ;;  %v524_v2 = vadd.f32 1.0, %v1539_v58  ;;  %v2276_v5 = vmul.f32 %v522_v52, %v474_v0 }
 0x1aa   : > { %v1543_v3 = vpop.eup %1542  ;;  %v525_v63 = vadd.f32 1.0, %v1541_v62 }
 0x1ab   : > { %v1545_v6 = vpop.eup %1544  ;;  %v2282_v1 = vmul.f32 %v524_v2, %v476_v4  ;;  %v532_v11 = vadd.f32 1.0, %v1543_v3 }
 0x1ac   : > { %568 = vadd.xlane.f32.xlu0 %v2265_v56  ;;  %v1547_v12 = vpop.eup %1546  ;;  %v2285_v14 = vmul.f32 %v525_v63, %v477_v7  ;;  %v533_v8 = vadd.f32 1.0, %v1545_v6 }
 0x1ad   : > { %574 = vadd.xlane.f32.xlu1 %v2268_v61  ;;  %v1549_v16 = vpop.eup %1548  ;;  %v2290_v10 = vmul.f32 %v532_v11, %v484_v9  ;;  %v526_v15 = vadd.f32 1.0, %v1547_v12 }
 0x1ae   : > { %v1551_v18 = vpop.eup %1550  ;;  %v2293_v21 = vmul.f32 %v533_v8, %v485_v13  ;;  %v527_v20 = vadd.f32 1.0, %v1549_v16 }
 0x1af   : > { %v1553_v22 = vpop.eup %1552  ;;  %v2297_v24 = vmul.f32 %v526_v15, %v478_v17  ;;  %v534_v25 = vadd.f32 1.0, %v1551_v18 }
 0x1b0   : > { %572 = vadd.xlane.f32.xlu0 %v2273_v60  ;;  %v2299_v27 = vmul.f32 %v527_v20, %v479_v19  ;;  %v535_v28 = vadd.f32 1.0, %v1553_v22 }
 0x1b1   : > { %556 = vadd.xlane.f32.xlu1 %v2276_v5  ;;  %v2303_v30 = vmul.f32 %v534_v25, %v486_v23 }
 0x1b2   : > { %v2305_v31 = vmul.f32 %v535_v28, %v487_v26 }
 0x1b4   : > { %560 = vadd.xlane.f32.xlu0 %v2282_v1 }
 0x1b5   : > { %562 = vadd.xlane.f32.xlu1 %v2285_v14 }
 0x1b8   : > { %576 = vadd.xlane.f32.xlu0 %v2290_v10 }
 0x1b9   : > { %578 = vadd.xlane.f32.xlu1 %v2293_v21 }
 0x1bc   : > { %564 = vadd.xlane.f32.xlu0 %v2297_v24 }
 0x1bd   : > { %566 = vadd.xlane.f32.xlu1 %v2299_v27 }
 0x1c0   : > { %580 = vadd.xlane.f32.xlu0 %v2303_v30 }
 0x1c1   : > { %582 = vadd.xlane.f32.xlu1 %v2305_v31 }
 0x231   : > { %v555_v32 = vpop.xlane.xlu0 %554 }
 0x232   : > { %v586_v33 = vmul.f32 0.0078125, %v555_v32  ;;  %v571_v34 = vpop.xlane.xlu1 %570 }
 0x233   : > { %v594_v35 = vmul.f32 0.0078125, %v571_v34 }
 0x234   : > { %v2310_v37 = vsub.f32 %v2243_v29, %v586_v33 }
 0x235   : > { %v553_v38 = vpop.xlane.xlu0 %552  ;;  %v2313_v39 = vsub.f32 %v2249_v36, %v594_v35 }
 0x236   : > { %v585_v40 = vmul.f32 0.0078125, %v553_v38  ;;  %v618_v46 = vmul.f32 %v2310_v37, %v2310_v37  ;;  %v559_v47 = vpop.xlane.xlu1 %558 }
 0x237   : > { %v588_v48 = vmul.f32 0.0078125, %v559_v47  ;;  %v626_v53 = vmul.f32 %v2313_v39, %v2313_v39 }
 0x238   : > { %v2318_v49 = vsub.f32 %v2257_v45, %v585_v40  ;;  %635 = vadd.xlane.f32.xlu1 %v618_v46 }
 0x239   : > { %v569_v50 = vpop.xlane.xlu0 %568  ;;  %v2321_v51 = vsub.f32 %v2255_v42, %v588_v48 }
 0x23a   : > { %v593_v29 = vmul.f32 0.0078125, %v569_v50  ;;  %v617_v36 = vmul.f32 %v2318_v49, %v2318_v49  ;;  %v575_v54 = vpop.xlane.xlu1 %574 }
 0x23b   : > { %v596_v55 = vmul.f32 0.0078125, %v575_v54  ;;  %v620_v42 = vmul.f32 %v2321_v51, %v2321_v51 }
 0x23c   : > { %v2328_v57 = vsub.f32 %v2265_v56, %v593_v29  ;;  %651 = vadd.xlane.f32.xlu1 %v626_v53  ;;  %633 = vadd.xlane.f32.xlu0 %v617_v36 }
 0x23d   : > { %v573_v45 = vpop.xlane.xlu0 %572  ;;  %v2331_v58 = vsub.f32 %v2268_v61, %v596_v55 }
 0x23e   : > { %v625_v59 = vmul.f32 %v2328_v57, %v2328_v57  ;;  %v557_v44 = vpop.xlane.xlu1 %556  ;;  %v595_v62 = vmul.f32 0.0078125, %v573_v45  ;;  %v731_v45 = vsub.s32 1, %v2194_v41 }
 0x23f   : > { %v587_v52 = vmul.f32 0.0078125, %v557_v44  ;;  %v628_v2 = vmul.f32 %v2331_v58, %v2331_v58  ;;  %v751_v44 = vsub.s32 2, %v2194_v41 }
 0x240   : > { %639 = vadd.xlane.f32.xlu1 %v620_v42  ;;  %649 = vadd.xlane.f32.xlu0 %v625_v59  ;;  %v2343_v3 = vsub.f32 %v2273_v60, %v595_v62 }
 0x241   : > { %v561_v0 = vpop.xlane.xlu0 %560  ;;  %v2338_v56 = vsub.f32 %v2276_v5, %v587_v52 }
 0x242   : > { %v563_v61 = vpop.xlane.xlu1 %562  ;;  %v589_v63 = vmul.f32 0.0078125, %v561_v0  ;;  %v627_v8 = vmul.f32 %v2343_v3, %v2343_v3  ;;  %v2392_v0 = vrot.slane %v2200_v43, %v731_v45 }
 0x243   : > { %v590_v4 = vmul.f32 0.0078125, %v563_v61  ;;  %v619_v6 = vmul.f32 %v2338_v56, %v2338_v56 }
 0x244   : > { %655 = vadd.xlane.f32.xlu1 %v628_v2  ;;  %v2351_v12 = vsub.f32 %v2282_v1, %v589_v63 }
 0x245   : > { %v577_v7 = vpop.xlane.xlu0 %576  ;;  %v2348_v9 = vsub.f32 %v2285_v14, %v590_v4  ;;  %637 = vadd.xlane.f32.xlu0 %v619_v6  ;;  %v2395_v6 = vrot.slane %v2200_v43, %v751_v44 }
 0x246   : > { %v579_v5 = vpop.xlane.xlu1 %578  ;;  %v597_v11 = vmul.f32 0.0078125, %v577_v7  ;;  %v621_v20 = vmul.f32 %v2351_v12, %v2351_v12 }
 0x247   : > { %v598_v13 = vmul.f32 0.0078125, %v579_v5  ;;  %v622_v60 = vmul.f32 %v2348_v9, %v2348_v9 }
 0x248   : > { %v2361_v14 = vsub.f32 %v2290_v10, %v597_v11 }
 0x249   : > { %v565_v16 = vpop.xlane.xlu0 %564  ;;  %v2358_v17 = vsub.f32 %v2293_v21, %v598_v13  ;;  %643 = vadd.xlane.f32.xlu1 %v622_v60  ;;  %653 = vadd.xlane.f32.xlu0 %v627_v8 }
 0x24a   : > { %v567_v15 = vpop.xlane.xlu1 %566  ;;  %v591_v1 = vmul.f32 0.0078125, %v565_v16  ;;  %v629_v10 = vmul.f32 %v2361_v14, %v2361_v14 }
 0x24b   : > { %v592_v18 = vmul.f32 0.0078125, %v567_v15  ;;  %v630_v19 = vmul.f32 %v2358_v17, %v2358_v17 }
 0x24c   : > { %v2373_v25 = vsub.f32 %v2297_v24, %v591_v1 }
 0x24d   : > { %v581_v22 = vpop.xlane.xlu0 %580  ;;  %v2368_v23 = vsub.f32 %v2299_v27, %v592_v18  ;;  %659 = vadd.xlane.f32.xlu1 %v630_v19  ;;  %641 = vadd.xlane.f32.xlu0 %v621_v20 }
 0x24e   : > { %v583_v21 = vpop.xlane.xlu1 %582  ;;  %v599_v28 = vmul.f32 0.0078125, %v581_v22  ;;  %v623_v24 = vmul.f32 %v2373_v25, %v2373_v25 }
 0x24f   : > { %v600_v26 = vmul.f32 0.0078125, %v583_v21  ;;  %v624_v32 = vmul.f32 %v2368_v23, %v2368_v23 }
 0x250   : > { %v2381_v27 = vsub.f32 %v2303_v30, %v599_v28 }
 0x251   : > { %v2378_v33 = vsub.f32 %v2305_v31, %v600_v26  ;;  %647 = vadd.xlane.f32.xlu1 %v624_v32  ;;  %657 = vadd.xlane.f32.xlu0 %v629_v10 }
 0x252   : > { %v631_v35 = vmul.f32 %v2381_v27, %v2381_v27 }
 0x253   : > { %v632_v34 = vmul.f32 %v2378_v33, %v2378_v33 }
 0x255   : > { %663 = vadd.xlane.f32.xlu1 %v632_v34  ;;  %645 = vadd.xlane.f32.xlu0 %v623_v24 }
 0x259   : > { %661 = vadd.xlane.f32.xlu0 %v631_v35 }
 0x2c5   : > { %v636_v38 = vpop.xlane.xlu1 %635 }
 0x2c6   : > { %v666_v31 = vmul.f32 0.0078125, %v636_v38 }
 0x2c8   : > { %v682_v40 = vadd.f32 1e-12, %v666_v31 }
 0x2c9   : > { %v652_v46 = vpop.xlane.xlu1 %651  ;;  %v634_v47 = vpop.xlane.xlu0 %633 }
 0x2ca   : > { %1554 = vrsqrt.f32 %v682_v40  ;;  %v674_v30 = vmul.f32 0.0078125, %v652_v46  ;;  %v665_v48 = vmul.f32 0.0078125, %v634_v47 }
 0x2cc   : > { %v690_v50 = vadd.f32 1e-12, %v674_v30  ;;  %v681_v29 = vadd.f32 1e-12, %v665_v48 }
 0x2cd   : > { %v640_v53 = vpop.xlane.xlu1 %639  ;;  %v650_v36 = vpop.xlane.xlu0 %649 }
 0x2ce   : > { %1556 = vrsqrt.f32 %v690_v50  ;;  %v668_v54 = vmul.f32 0.0078125, %v640_v53  ;;  %v673_v55 = vmul.f32 0.0078125, %v650_v36 }
 0x2cf   : > { %1558 = vrsqrt.f32 %v681_v29 }
 0x2d0   : > { %v684_v42 = vadd.f32 1e-12, %v668_v54  ;;  %v689_v59 = vadd.f32 1e-12, %v673_v55 }
 0x2d1   : > { %v656_v52 = vpop.xlane.xlu1 %655 }
 0x2d2   : > { %1560 = vrsqrt.f32 %v684_v42  ;;  %v676_v62 = vmul.f32 0.0078125, %v656_v52  ;;  %v638_v2 = vpop.xlane.xlu0 %637 }
 0x2d3   : > { %1562 = vrsqrt.f32 %v689_v59  ;;  %v667_v63 = vmul.f32 0.0078125, %v638_v2 }
 0x2d4   : > { %v1555_v61 = vpop.eup %1554  ;;  %v692_v4 = vadd.f32 1e-12, %v676_v62 }
 0x2d5   : > { %v714_v7 = vmul.f32 %v1555_v61, %v2310_v37  ;;  %v683_v5 = vadd.f32 1e-12, %v667_v63 }
 0x2d6   : > { %1564 = vrsqrt.f32 %v692_v4  ;;  %v644_v11 = vpop.xlane.xlu1 %643  ;;  %v654_v13 = vpop.xlane.xlu0 %653 }
 0x2d7   : > { %v734_v41 = vmul.f32 %v2392_v0, %v714_v7  ;;  %1566 = vrsqrt.f32 %v683_v5  ;;  %v670_v8 = vmul.f32 0.0078125, %v644_v11  ;;  %v675_v16 = vmul.f32 0.0078125, %v654_v13 }
 0x2d8   : > { %v1557_v60 = vpop.eup %1556 }
 0x2d9   : > { %v1559_v15 = vpop.eup %1558  ;;  %v754_v18 = vadd.f32 %v2395_v6, %v734_v41  ;;  %v722_v1 = vmul.f32 %v1557_v60, %v2313_v39  ;;  %v686_v19 = vadd.f32 1e-12, %v670_v8  ;;  %v691_v20 = vadd.f32 1e-12, %v675_v16 }
 0x2da   : > { %v713_v43 = vmul.f32 %v1559_v15, %v2318_v49  ;;  %v660_v22 = vpop.xlane.xlu1 %659  ;;  %v642_v21 = vpop.xlane.xlu0 %641 }
 0x2db   : > { %770 = vst [vmem:[#allocation2 + $0x8] sm:$0xff] %v754_v18  ;;  %v742_v37 = vmul.f32 %v2392_v0, %v722_v1  ;;  %1568 = vrsqrt.f32 %v686_v19  ;;  %v678_v28 = vmul.f32 0.0078125, %v660_v22  ;;  %v669_v32 = vmul.f32 0.0078125, %v642_v21 }
 0x2dc   : > { %v1561_v10 = vpop.eup %1560  ;;  %v733_v26 = vmul.f32 %v2392_v0, %v713_v43  ;;  %1570 = vrsqrt.f32 %v691_v20 }
 0x2dd   : > { %v1563_v34 = vpop.eup %1562  ;;  %v762_v24 = vadd.f32 %v2395_v6, %v742_v37  ;;  %v716_v39 = vmul.f32 %v1561_v10, %v2321_v51  ;;  %v694_v38 = vadd.f32 1e-12, %v678_v28  ;;  %v685_v31 = vadd.f32 1e-12, %v669_v32 }
 0x2de   : > { %v753_v49 = vadd.f32 %v2395_v6, %v733_v26  ;;  %v721_v35 = vmul.f32 %v1563_v34, %v2328_v57  ;;  %v648_v46 = vpop.xlane.xlu1 %647  ;;  %v658_v47 = vpop.xlane.xlu0 %657 }
 0x2df   : > { %778 = vst [vmem:[#allocation2 + $0x48] sm:$0xff] %v762_v24  ;;  %v736_v40 = vmul.f32 %v2392_v0, %v716_v39  ;;  %1572 = vrsqrt.f32 %v694_v38  ;;  %v672_v50 = vmul.f32 0.0078125, %v648_v46  ;;  %v677_v29 = vmul.f32 0.0078125, %v658_v47 }
 0x2e0   : > { %v1565_v30 = vpop.eup %1564  ;;  %769 = vst [vmem:[#allocation2] sm:$0xff] %v753_v49  ;;  %v741_v48 = vmul.f32 %v2392_v0, %v721_v35  ;;  %1574 = vrsqrt.f32 %v685_v31 }
 0x2e1   : > { %v756_v51 = vadd.f32 %v2395_v6, %v736_v40  ;;  %v724_v53 = vmul.f32 %v1565_v30, %v2331_v58  ;;  %v1567_v57 = vpop.eup %1566  ;;  %v688_v54 = vadd.f32 1e-12, %v672_v50  ;;  %v693_v55 = vadd.f32 1e-12, %v677_v29 }
 0x2e2   : > { %v761_v36 = vadd.f32 %v2395_v6, %v741_v48  ;;  %v715_v42 = vmul.f32 %v1567_v57, %v2338_v56  ;;  %v664_v59 = vpop.xlane.xlu1 %663  ;;  %v646_v44 = vpop.xlane.xlu0 %645 }
 0x2e3   : > { %772 = vst [vmem:[#allocation2 + $0x18] sm:$0xff] %v756_v51  ;;  %v744_v45 = vmul.f32 %v2392_v0, %v724_v53  ;;  %1576 = vrsqrt.f32 %v688_v54  ;;  %v680_v52 = vmul.f32 0.0078125, %v664_v59  ;;  %v671_v62 = vmul.f32 0.0078125, %v646_v44 }
 0x2e4   : > { %777 = vst [vmem:[#allocation2 + $0x40] sm:$0xff] %v761_v36  ;;  %v735_v58 = vmul.f32 %v2392_v0, %v715_v42  ;;  %1578 = vrsqrt.f32 %v693_v55 }
 0x2e5   : > { %v764_v2 = vadd.f32 %v2395_v6, %v744_v45  ;;  %v1569_v61 = vpop.eup %1568  ;;  %v696_v4 = vadd.f32 1e-12, %v680_v52  ;;  %v687_v63 = vadd.f32 1e-12, %v671_v62 }
 0x2e6   : > { %v1571_v7 = vpop.eup %1570  ;;  %v755_v5 = vadd.f32 %v2395_v6, %v735_v58  ;;  %v718_v56 = vmul.f32 %v1569_v61, %v2348_v9  ;;  %v662_v41 = vpop.xlane.xlu0 %661 }
 0x2e7   : > { %780 = vst [vmem:[#allocation2 + $0x58] sm:$0xff] %v764_v2  ;;  %v723_v11 = vmul.f32 %v1571_v7, %v2343_v3  ;;  %1580 = vrsqrt.f32 %v696_v4  ;;  %v679_v13 = vmul.f32 0.0078125, %v662_v41 }
 0x2e8   : > { %771 = vst [vmem:[#allocation2 + $0x10] sm:$0xff] %v755_v5  ;;  %v738_v60 = vmul.f32 %v2392_v0, %v718_v56  ;;  %1582 = vrsqrt.f32 %v687_v63 }
 0x2e9   : > { %v1573_v8 = vpop.eup %1572  ;;  %v743_v16 = vmul.f32 %v2392_v0, %v723_v11  ;;  %v695_v15 = vadd.f32 1e-12, %v679_v13 }
 0x2ea   : > { %v1575_v18 = vpop.eup %1574  ;;  %v758_v1 = vadd.f32 %v2395_v6, %v738_v60  ;;  %v726_v43 = vmul.f32 %v1573_v8, %v2358_v17 }
 0x2eb   : > { %v763_v9 = vadd.f32 %v2395_v6, %v743_v16  ;;  %v717_v19 = vmul.f32 %v1575_v18, %v2351_v12  ;;  %1584 = vrsqrt.f32 %v695_v15 }
 0x2ec   : > { %774 = vst [vmem:[#allocation2 + $0x28] sm:$0xff] %v758_v1  ;;  %v746_v3 = vmul.f32 %v2392_v0, %v726_v43 }
 0x2ed   : > { %v1577_v20 = vpop.eup %1576  ;;  %779 = vst [vmem:[#allocation2 + $0x50] sm:$0xff] %v763_v9  ;;  %v737_v37 = vmul.f32 %v2392_v0, %v717_v19 }
 0x2ee   : > { %v1579_v22 = vpop.eup %1578  ;;  %v766_v21 = vadd.f32 %v2395_v6, %v746_v3  ;;  %v720_v10 = vmul.f32 %v1577_v20, %v2368_v23 }
 0x2ef   : > { %v757_v26 = vadd.f32 %v2395_v6, %v737_v37  ;;  %v725_v17 = vmul.f32 %v1579_v22, %v2361_v14 }
 0x2f0   : > { %782 = vst [vmem:[#allocation2 + $0x68] sm:$0xff] %v766_v21  ;;  %v740_v12 = vmul.f32 %v2392_v0, %v720_v10 }
 0x2f1   : > { %v1581_v28 = vpop.eup %1580  ;;  %773 = vst [vmem:[#allocation2 + $0x20] sm:$0xff] %v757_v26  ;;  %v745_v32 = vmul.f32 %v2392_v0, %v725_v17 }
 0x2f2   : > { %v1583_v34 = vpop.eup %1582  ;;  %v760_v24 = vadd.f32 %v2395_v6, %v740_v12  ;;  %v728_v39 = vmul.f32 %v1581_v28, %v2378_v33 }
 0x2f3   : > { %v765_v49 = vadd.f32 %v2395_v6, %v745_v32  ;;  %v719_v23 = vmul.f32 %v1583_v34, %v2373_v25 }
 0x2f4   : > { %776 = vst [vmem:[#allocation2 + $0x38] sm:$0xff] %v760_v24  ;;  %v748_v35 = vmul.f32 %v2392_v0, %v728_v39 }
 0x2f5   : > { %v1585_v14 = vpop.eup %1584  ;;  %781 = vst [vmem:[#allocation2 + $0x60] sm:$0xff] %v765_v49  ;;  %v739_v38 = vmul.f32 %v2392_v0, %v719_v23 }
 0x2f6   : > { %v768_v31 = vadd.f32 %v2395_v6, %v748_v35  ;;  %v727_v40 = vmul.f32 %v1585_v14, %v2381_v27 }
 0x2f7   : > { %v759_v46 = vadd.f32 %v2395_v6, %v739_v38 }
 0x2f8   : > { %784 = vst [vmem:[#allocation2 + $0x78] sm:$0xff] %v768_v31  ;;  %v747_v33 = vmul.f32 %v2392_v0, %v727_v40 }
 0x2f9   : > { %775 = vst [vmem:[#allocation2 + $0x30] sm:$0xff] %v759_v46 }
 0x2fa   : > { %v767_v47 = vadd.f32 %v2395_v6, %v747_v33 }
 0x2fc   : > { %783 = vst [vmem:[#allocation2 + $0x70] sm:$0xff] %v767_v47 }
 0x2fd PF: > { %v802_v25 = vld [vmem:[%s2166_s8 + $0x8] sm:$0xff]  ;;  %v804_v27 = vld [vmem:[%s2166_s8 + $0x18] sm:$0xff]  ;;  %v801_v30 = vld [vmem:[%s2166_s8] sm:$0xff]  ;;  %v1838_v6 = vmov 0.0   ;;  %s2672_s6 = sld [smem:[#allocation16_spill]]  ;;  %s2673_s27 = sld [smem:[#allocation17_spill]] }
 0x2fe   : > { %v1307_v48 = vpack.c.bf16 %v804_v27, %v802_v25  ;;  %v803_v0 = vld [vmem:[%s2166_s8 + $0x10] sm:$0xff]  ;;  %v806_v50 = vld [vmem:[%s2166_s8 + $0x28] sm:$0xff]  ;;  %v808_v29 = vld [vmem:[%s2166_s8 + $0x38] sm:$0xff]  ;;  %897 = vmatprep.mubr.f32.mxu0 %v1838_v6  ;;  %945 = vmatprep.mubr.f32.mxu1 %v1838_v6  ;;  %s1043_s25 = sshll.u32 %s2175_s4, 4  ;;  %s2674_s11 = sld [smem:[#allocation27_spill]]  ;;  %s2529_s25 = int_to_ptr.vmem [resolvable:$true] %s1043_s25 }
 0x2ff   : > { %v1309_v51 = vpack.c.bf16 %v803_v0, %v801_v30  ;;  %v1311_v53 = vpack.c.bf16 %v808_v29, %v806_v50  ;;  %v805_v57 = vld [vmem:[%s2166_s8 + $0x20] sm:$0xff]  ;;  %v807_v36 = vld [vmem:[%s2166_s8 + $0x30] sm:$0xff]  ;;  %v810_v54 = vld [vmem:[%s2166_s8 + $0x48] sm:$0xff]  ;;  %s2537_s0 = scalar_lea.sflag [#allocation5], %s279_s5  ;;  %s1674_s12 = scalar_lea.vmem %s2529_s25, 4096 }
 0x300   : > { %1308 = vmatprep.subr.bf16.mxu0 %v1307_v48  ;;  %1355 = vmatprep.subr.bf16.mxu1 %v1307_v48  ;;  %v812_v55 = vld [vmem:[%s2166_s8 + $0x58] sm:$0xff]  ;;  %v1313_v45 = vpack.c.bf16 %v807_v36, %v805_v57  ;;  %v809_v59 = vld [vmem:[%s2166_s8 + $0x40] sm:$0xff]  ;;  %v811_v44 = vld [vmem:[%s2166_s8 + $0x50] sm:$0xff]  ;;  %p1675_p3 = scmp.ne.s32.totalorder %s2529_s25, %s1674_s12  ;;  %p2675_p11 = scmp.ne.s32.totalorder %s2656_s18, 0 }
 0x301   : > { %1310 = vmatpush1.bf16.msra.mxu0 %v1309_v51  ;;  %1363 = vmatpush1.bf16.msra.mxu1 %v1309_v51  ;;  %v1315_v42 = vpack.c.bf16 %v812_v55, %v810_v54  ;;  %v814_v52 = vld [vmem:[%s2166_s8 + $0x68] sm:$0xff]  ;;  %v816_v62 = vld [vmem:[%s2166_s8 + $0x78] sm:$0xff]  ;;  %v1317_v2 = vpack.c.bf16 %v811_v44, %v809_v59  ;;  %v813_v61 = vld [vmem:[%s2166_s8 + $0x60] sm:$0xff] }
 0x302   : > { %1312 = vmatprep.subr.bf16.mxu0 %v1311_v53  ;;  %1356 = vmatprep.subr.bf16.mxu1 %v1311_v53  ;;  %v1319_v58 = vpack.c.bf16 %v816_v62, %v814_v52  ;;  %v815_v4 = vld [vmem:[%s2166_s8 + $0x70] sm:$0xff]  ;;  %v818_v63 = vld [vmem:[%s2166_s8 + $0x88] sm:$0xff]  ;;  %v820_v7 = vld [vmem:[%s2166_s8 + $0x98] sm:$0xff]  ;;  %p1676_p9 = pnand %p1675_p3, %p2675_p11 }
 0x303   : > { %v1321_v5 = vpack.c.bf16 %v815_v4, %v813_v61  ;;  %v1323_v56 = vpack.c.bf16 %v820_v7, %v818_v63  ;;  %v817_v41 = vld [vmem:[%s2166_s8 + $0x80] sm:$0xff]  ;;  %v819_v11 = vld [vmem:[%s2166_s8 + $0x90] sm:$0xff]  ;;  %v822_v13 = vld [vmem:[%s2166_s8 + $0xa8] sm:$0xff]  ;;  %s1179_s20 = sshll.u32 %s2672_s6, 1  ;;  %s1186_s23 = sshll.u32 %s2673_s27, 7 }
 0x304   : > { %v824_v60 = vld [vmem:[%s2166_s8 + $0xb8] sm:$0xff]  ;;  %v1325_v8 = vpack.c.bf16 %v819_v11, %v817_v41  ;;  %v821_v15 = vld [vmem:[%s2166_s8 + $0xa0] sm:$0xff]  ;;  %v823_v18 = vld [vmem:[%s2166_s8 + $0xb0] sm:$0xff]  ;;  %s1040_s26 = sadd.s32 %s1186_s23, %s1179_s20  ;;  %p1677_p12 = pneg %p1676_p9 }
 0x305   : > { %1314 = vmatpush1.bf16.msra.mxu0 %v1313_v45  ;;  %1364 = vmatpush1.bf16.msra.mxu1 %v1313_v45  ;;  %v1327_v16 = vpack.c.bf16 %v824_v60, %v822_v13  ;;  %v826_v1 = vld [vmem:[%s2166_s8 + $0xc8] sm:$0xff]  ;;  %v828_v43 = vld [vmem:[%s2166_s8 + $0xd8] sm:$0xff]  ;;  %v1329_v9 = vpack.c.bf16 %v823_v18, %v821_v15  ;;  %v825_v3 = vld [vmem:[%s2166_s8 + $0xc0] sm:$0xff]  ;;  %s1181_s13 = sshll.u32 %s1040_s26, 7 }
 0x306   : > { %1316 = vmatprep.subr.bf16.mxu0 %v1315_v42  ;;  %1357 = vmatprep.subr.bf16.mxu1 %v1315_v42  ;;  %v1331_v19 = vpack.c.bf16 %v828_v43, %v826_v1  ;;  %v827_v20 = vld [vmem:[%s2166_s8 + $0xd0] sm:$0xff]  ;;  %v830_v37 = vld [vmem:[%s2166_s8 + $0xe8] sm:$0xff]  ;;  %v832_v22 = vld [vmem:[%s2166_s8 + $0xf8] sm:$0xff]  ;;  %s2527_s9 = scalar_lea.hbm %s2674_s11, %s1181_s13 }
 0x307   : > { %v1333_v21 = vpack.c.bf16 %v827_v20, %v825_v3  ;;  %v1335_v10 = vpack.c.bf16 %v832_v22, %v830_v37  ;;  %v829_v26 = vld [vmem:[%s2166_s8 + $0xe0] sm:$0xff]  ;;  %v831_v17 = vld [vmem:[%s2166_s8 + $0xf0] sm:$0xff]  ;;  %v786_v34 = vld [vmem:[#allocation2 + $0x8] sm:$0xff]  ;;  %s1839_s8 = smov [#allocation9]  }
 0x308   : > { %v1337_v12 = vpack.c.bf16 %v831_v17, %v829_v26  ;;  %v785_v28 = vld [vmem:[#allocation2] sm:$0xff]  ;;  %v794_v24 = vld [vmem:[#allocation2 + $0x48] sm:$0xff]  ;;  %v787_v39 = vld [vmem:[#allocation2 + $0x10] sm:$0xff]  ;;  %s1678_s10 = sshll.u32 %s1839_s8, 4  ;;  %s1679_s10 = int_to_ptr.vmem [resolvable:$false] %s1678_s10 }
 0x309   : > { %1318 = vmatpush1.bf16.msra.mxu0 %v1317_v2  ;;  %1365 = vmatpush1.bf16.msra.mxu1 %v1317_v2  ;;  %v793_v32 = vld [vmem:[#allocation2 + $0x40] sm:$0xff]  ;;  %v795_v49 = vld [vmem:[#allocation2 + $0x50] sm:$0xff]  ;;  %v788_v23 = vld [vmem:[#allocation2 + $0x18] sm:$0xff]  ;;  %s1680_s29 = scalar_lea.vmem %s1679_s10, 8192  ;;  %p1681_p6 = scmp.lt.s32.totalorder %s2529_s25, %s1679_s10 }
 0x30a   : > { %1320 = vmatprep.subr.bf16.mxu0 %v1319_v58  ;;  %1358 = vmatprep.subr.bf16.mxu1 %v1319_v58  ;;  %v796_v35 = vld [vmem:[#allocation2 + $0x58] sm:$0xff]  ;;  %v789_v14 = vld [vmem:[#allocation2 + $0x20] sm:$0xff]  ;;  %v790_v31 = vld [vmem:[#allocation2 + $0x28] sm:$0xff]  ;;  %p1682_p5 = scmp.lt.s32.totalorder %s1680_s29, %s1674_s12 }
 0x30b   : > { %v797_v38 = vld [vmem:[#allocation2 + $0x60] sm:$0xff]  ;;  %v798_v40 = vld [vmem:[#allocation2 + $0x68] sm:$0xff]  ;;  %v791_v46 = vld [vmem:[#allocation2 + $0x30] sm:$0xff] }
 0x30c   : > { %v799_v33 = vld [vmem:[#allocation2 + $0x70] sm:$0xff]  ;;  %v792_v47 = vld [vmem:[#allocation2 + $0x38] sm:$0xff]  ;;  %p1683_p4 = por %p1682_p5, %p1681_p6 }
 0x30d   : > { %1322 = vmatpush1.bf16.msra.mxu0 %v1321_v5  ;;  %1366 = vmatpush1.bf16.msra.mxu1 %v1321_v5  ;;  %v800_v25 = vld [vmem:[#allocation2 + $0x78] sm:$0xff] }
 0x30e   : > { %1324 = vmatprep.subr.bf16.mxu0 %v1323_v56  ;;  %1359 = vmatprep.subr.bf16.mxu1 %v1323_v56  ;;  %p1684_p10 = pnand %p1683_p4, %p1677_p12 }
 0x311   : > { %1326 = vmatpush1.bf16.msra.mxu0 %v1325_v8  ;;  %1367 = vmatpush1.bf16.msra.mxu1 %v1325_v8 }
 0x312   : > { %1328 = vmatprep.subr.bf16.mxu0 %v1327_v16  ;;  %1360 = vmatprep.subr.bf16.mxu1 %v1327_v16 }
 0x315   : > { %1330 = vmatpush1.bf16.msra.mxu0 %v1329_v9  ;;  %1368 = vmatpush1.bf16.msra.mxu1 %v1329_v9 }
 0x316   : > { %1332 = vmatprep.subr.bf16.mxu0 %v1331_v19  ;;  %1361 = vmatprep.subr.bf16.mxu1 %v1331_v19 }
 0x319   : > { %1334 = vmatpush1.bf16.msra.mxu0 %v1333_v21  ;;  %1369 = vmatpush1.bf16.msra.mxu1 %v1333_v21 }
 0x31a   : > { %1336 = vmatprep.subr.bf16.mxu0 %v1335_v10  ;;  %1362 = vmatprep.subr.bf16.mxu1 %v1335_v10 }
 0x31d   : > { %1338 = vmatpush1.bf16.msra.mxu0 %v1337_v12  ;;  %1370 = vmatpush1.bf16.msra.mxu1 %v1337_v12 }
 0x320   : > { %898 = vmatmul.mubr.f32.vlgmr.msra.gmra.mrb[0].mxu0 %v785_v28  ;;  %946 = vmatmul.mubr.f32.vlgmr.msra.gmra.mrb[0].mxu1 %v793_v32 }
 0x321   : > { %903 = vmatprep.mubr.f32.mxu0 %v1838_v6  ;;  %951 = vmatprep.mubr.f32.mxu1 %v1838_v6 }
 0x324   : > { %904 = vmatmul.mubr.f32.gmra.mrb[2].mxu0 %v786_v34  ;;  %952 = vmatmul.mubr.f32.gmra.mrb[2].mxu1 %v794_v24 }
 0x325   : > { %909 = vmatprep.mubr.f32.mxu0 %v1838_v6  ;;  %957 = vmatprep.mubr.f32.mxu1 %v1838_v6 }
 0x328   : > { %910 = vmatmul.mubr.f32.gmra.mrb[4].mxu0 %v787_v39  ;;  %958 = vmatmul.mubr.f32.gmra.mrb[4].mxu1 %v795_v49 }
 0x329   : > { %915 = vmatprep.mubr.f32.mxu0 %v1838_v6  ;;  %963 = vmatprep.mubr.f32.mxu1 %v1838_v6 }
 0x32c   : > { %916 = vmatmul.mubr.f32.gmra.mrb[6].mxu0 %v788_v23  ;;  %964 = vmatmul.mubr.f32.gmra.mrb[6].mxu1 %v796_v35 }
 0x32d   : > { %921 = vmatprep.mubr.f32.mxu0 %v1838_v6  ;;  %969 = vmatprep.mubr.f32.mxu1 %v1838_v6 }
 0x330   : > { %922 = vmatmul.mubr.f32.gmra.mrb[8].mxu0 %v789_v14  ;;  %970 = vmatmul.mubr.f32.gmra.mrb[8].mxu1 %v797_v38 }
 0x331   : > { %927 = vmatprep.mubr.f32.mxu0 %v1838_v6  ;;  %975 = vmatprep.mubr.f32.mxu1 %v1838_v6 }
 0x334   : > { %928 = vmatmul.mubr.f32.gmra.mrb[10].mxu0 %v790_v31  ;;  %976 = vmatmul.mubr.f32.gmra.mrb[10].mxu1 %v798_v40 }
 0x335   : > { %933 = vmatprep.mubr.f32.mxu0 %v1838_v6  ;;  %981 = vmatprep.mubr.f32.mxu1 %v1838_v6 }
 0x338   : > { %934 = vmatmul.mubr.f32.gmra.mrb[12].mxu0 %v791_v46  ;;  %982 = vmatmul.mubr.f32.gmra.mrb[12].mxu1 %v799_v33 }
 0x339   : > { %939 = vmatprep.mubr.f32.mxu0 %v1838_v6  ;;  %987 = vmatprep.mubr.f32.mxu1 %v1838_v6 }
 0x33c   : > { %940 = vmatmul.mubr.f32.gmra.mrb[14].mxu0 %v792_v47  ;;  %988 = vmatmul.mubr.f32.gmra.mrb[14].mxu1 %v800_v25 }
 0x3f3   : > { %v899_v27 = vpop.f32.mrb[0].mxu0  ;;  %v947_v30 = vpop.f32.mrb[0].mxu1 }
 0x3f4   : > { %994 = vst [vmem:[%s2175_s4] sm:$0xff] %v899_v27  ;;  %1010 = vst [vmem:[%s2175_s4 + $0x80] sm:$0xff] %v947_v30  ;;  %v901_v48 = vpop.f32.mrb[1].mxu0  ;;  %v949_v0 = vpop.f32.mrb[1].mxu1 }
 0x3f5   : > { %995 = vst [vmem:[%s2175_s4 + $0x8] sm:$0xff] %v901_v48  ;;  %1011 = vst [vmem:[%s2175_s4 + $0x88] sm:$0xff] %v949_v0 }
 0x3f7   : > { %v905_v50 = vpop.f32.mrb[2].mxu0  ;;  %v953_v29 = vpop.f32.mrb[2].mxu1 }
 0x3f8   : > { %996 = vst [vmem:[%s2175_s4 + $0x10] sm:$0xff] %v905_v50  ;;  %1012 = vst [vmem:[%s2175_s4 + $0x90] sm:$0xff] %v953_v29  ;;  %v907_v6 = vpop.f32.mrb[3].mxu0  ;;  %v955_v51 = vpop.f32.mrb[3].mxu1 }
 0x3f9   : > { %997 = vst [vmem:[%s2175_s4 + $0x18] sm:$0xff] %v907_v6  ;;  %1013 = vst [vmem:[%s2175_s4 + $0x98] sm:$0xff] %v955_v51 }
 0x3fb   : > { %v911_v53 = vpop.f32.mrb[4].mxu0  ;;  %v959_v57 = vpop.f32.mrb[4].mxu1 }
 0x3fc   : > { %998 = vst [vmem:[%s2175_s4 + $0x20] sm:$0xff] %v911_v53  ;;  %1014 = vst [vmem:[%s2175_s4 + $0xa0] sm:$0xff] %v959_v57  ;;  %v913_v36 = vpop.f32.mrb[5].mxu0  ;;  %v961_v54 = vpop.f32.mrb[5].mxu1 }
 0x3fd   : > { %999 = vst [vmem:[%s2175_s4 + $0x28] sm:$0xff] %v913_v36  ;;  %1015 = vst [vmem:[%s2175_s4 + $0xa8] sm:$0xff] %v961_v54 }
 0x3ff   : > { %v917_v55 = vpop.f32.mrb[6].mxu0  ;;  %v965_v45 = vpop.f32.mrb[6].mxu1 }
 0x400   : > { %1000 = vst [vmem:[%s2175_s4 + $0x30] sm:$0xff] %v917_v55  ;;  %1016 = vst [vmem:[%s2175_s4 + $0xb0] sm:$0xff] %v965_v45  ;;  %v919_v42 = vpop.f32.mrb[7].mxu0  ;;  %v967_v59 = vpop.f32.mrb[7].mxu1 }
 0x401   : > { %1001 = vst [vmem:[%s2175_s4 + $0x38] sm:$0xff] %v919_v42  ;;  %1017 = vst [vmem:[%s2175_s4 + $0xb8] sm:$0xff] %v967_v59 }
 0x403   : > { %v923_v44 = vpop.f32.mrb[8].mxu0  ;;  %v971_v52 = vpop.f32.mrb[8].mxu1 }
 0x404   : > { %1002 = vst [vmem:[%s2175_s4 + $0x40] sm:$0xff] %v923_v44  ;;  %1018 = vst [vmem:[%s2175_s4 + $0xc0] sm:$0xff] %v971_v52  ;;  %v925_v62 = vpop.f32.mrb[9].mxu0  ;;  %v973_v2 = vpop.f32.mrb[9].mxu1 }
 0x405   : > { %1003 = vst [vmem:[%s2175_s4 + $0x48] sm:$0xff] %v925_v62  ;;  %1019 = vst [vmem:[%s2175_s4 + $0xc8] sm:$0xff] %v973_v2 }
 0x407   : > { %v929_v58 = vpop.f32.mrb[10].mxu0  ;;  %v977_v61 = vpop.f32.mrb[10].mxu1 }
 0x408   : > { %1004 = vst [vmem:[%s2175_s4 + $0x50] sm:$0xff] %v929_v58  ;;  %1020 = vst [vmem:[%s2175_s4 + $0xd0] sm:$0xff] %v977_v61  ;;  %v931_v4 = vpop.f32.mrb[11].mxu0  ;;  %v979_v63 = vpop.f32.mrb[11].mxu1 }
 0x409   : > { %1005 = vst [vmem:[%s2175_s4 + $0x58] sm:$0xff] %v931_v4  ;;  %1021 = vst [vmem:[%s2175_s4 + $0xd8] sm:$0xff] %v979_v63 }
 0x40b   : > { %v935_v7 = vpop.f32.mrb[12].mxu0  ;;  %v983_v5 = vpop.f32.mrb[12].mxu1 }
 0x40c   : > { %1006 = vst [vmem:[%s2175_s4 + $0x60] sm:$0xff] %v935_v7  ;;  %1022 = vst [vmem:[%s2175_s4 + $0xe0] sm:$0xff] %v983_v5  ;;  %v937_v56 = vpop.f32.mrb[13].mxu0  ;;  %v985_v41 = vpop.f32.mrb[13].mxu1 }
 0x40d   : > { %1007 = vst [vmem:[%s2175_s4 + $0x68] sm:$0xff] %v937_v56  ;;  %1023 = vst [vmem:[%s2175_s4 + $0xe8] sm:$0xff] %v985_v41 }
 0x40f   : > { %v941_v11 = vpop.f32.mrb[14].mxu0  ;;  %v989_v13 = vpop.f32.mrb[14].mxu1 }
 0x410   : > { %1008 = vst [vmem:[%s2175_s4 + $0x70] sm:$0xff] %v941_v11  ;;  %1024 = vst [vmem:[%s2175_s4 + $0xf0] sm:$0xff] %v989_v13  ;;  %v943_v60 = vpop.f32.mrb[15].mxu0  ;;  %v991_v8 = vpop.f32.mrb[15].mxu1 }
 0x411   : > { %1009 = vst [vmem:[%s2175_s4 + $0x78] sm:$0xff] %v943_v60  ;;  %1025 = vst [vmem:[%s2175_s4 + $0xf8] sm:$0xff] %v991_v8 }
 0x412   : > { %1687 = shalt.err (!%p1684_p10)
}
 0x413   : > { %s1688_s5 = scalar_lea.hbm %s2527_s9, 4096  ;;  %s1692_s30 = scalar_lea.hbm %s2674_s11, 32768 }
 0x414   : > { %p1689_p8 = scmp.ne.s32.totalorder %s2527_s9, %s1688_s5  ;;  %p1693_p13 = scmp.lt.u32.totalorder %s2527_s9, %s2674_s11 }
 0x415   : > { %p1694_p7 = scmp.lt.u32.totalorder %s1692_s30, %s1688_s5  ;;  %p1696_p3 = scmp.lt.u32.totalorder %s1688_s5, %s2527_s9 }
 0x416   : > { %p1690_p2 = pnand %p1689_p8, %p2675_p11 }
 0x417   : > { %p1695_p1 = por %p1694_p7, %p1693_p13 }
 0x418   : > { %p1691_p0 = pneg %p1690_p2 }
 0x419   : > { %p1697_p9 = por %p1696_p3, %p1695_p1 }
 0x41b   : > { %p1698_p12 = pnand %p1697_p9, %p1691_p0 }
 0x41d   : > { %1701 = shalt.err (!%p1698_p12)
}
 0x41e   : > { %s1840_s27 = smov 256   ;;  %s1841_s20 = smov 1024  }
 0x41f   : > { %s1842_s23 = smov 16  }
 0x420   : > { %1379 = dma.vmem_to_hbm [thread:$0]  (%p2675_p11), %s2529_s25, 4096, %s2527_s9, %s2537_s0, %s1840_s27, %s1841_s20, %s1842_s23  }
 0x421 PF: > { %p1399_p6 = scmp.ge.s32.totalorder %s1828_s28, 2  ;;  %s1058_s26 = sand.u32 1, %s1776_s15  }
 0x422   : > { %p2676_p5 = scmp.ne.s32.totalorder %s2657_s7, 0  ;;  %s1059_s13 = scalar_lea.sflag [#allocation5], %s1058_s26 }
 0x424   : > { %p1393_p4 = pnand %p1399_p6, %p2676_p5 }
 0x426   : > { %1771 = dma.done.wait (!%p1393_p4), %s1059_s13, 4096  }
 0x427   : > { %1773 = vsyncadd (!%p1393_p4), %s1059_s13, 4294963200  ;;  %s21_s28 = sadd.s32 1, %s1828_s28   ;;  %s2678_s18 = sld [smem:[#allocation23_spill]] }
 0x428   : > { %p2566_p10 = scmp.ge.s32.totalorder %s21_s28, 10   ;;  %s2679_s25 = sld [smem:[#allocation14_spill]] }
 0x429   : > { %s2680_s20 = sld [smem:[#allocation24_spill]]  ;;  %s2681_s24 = sld [smem:[#allocation15_spill]] }
 0x42a   : > { %s2682_s23 = sld [smem:[#allocation22_spill]]  ;;  %s2683_s7 = sld [smem:[#allocation18_spill]] }
 0x42b   : > { %s2684_s9 = sld [smem:[#allocation19_spill]]  ;;  %s2685_s26 = sld [smem:[#allocation20_spill]] }
 0x42c   : > { %s2686_s27 = sld [smem:[#allocation21_spill]]  ;;  %s2687_s15 = smov %s1780_s16 }
 0x42d   : > { %s2688_s16 = smov %s1784_s17  ;;  %s2689_s17 = smov %s2678_s18 }
 0x42e   : > { %s2690_s18 = smov %s1792_s19  ;;  %s2691_s19 = smov %s2679_s25 }
 0x42f   : > { %s2692_s21 = smov %s1804_s22  ;;  %s2693_s22 = smov %s2681_s24 }
 0x430   : > { %s2694_s24 = smov %s2683_s7  ;;  %20 = sbr.rel (!%p2566_p10) target bundleno = 15 (0xf), region = 100 }
 0x431   : > { %s2695_s25 = smov %s2684_s9 }
 0x437   :  { %1064 = vsyncpa [#allocation4], 1 }
 0x438   :  { %1066 = vsyncpa [#allocation4 + $0x1], 1 }
 0x439   :  { %1067 = vsyncpa [#allocation7], 1 }
 0x43a   :  { %1068 = vsyncpa [#allocation5], 1 }
 0x43b   :  { %1070 = vsyncpa [#allocation5 + $0x1], 1 }

</bundles_post_ra>
